<compile_context>
chip_gen: v6e
topology: v6e:2x2x1
jax: 0.10.0
libtpu: 0.0.40
codegen_flags: <defaults>
</compile_context>

<pallas_src>
import jax
import jax.numpy as jnp
from jax.experimental import pallas as pl
from jax.experimental.pallas import tpu as pltpu

# ---------------- config (small synthetic frozen transformer) ----------------
VOCAB = 100
B = 2             # batch (number of sentences)
S = 8             # padded sequence length
BS = B * S        # total token rows
H = 32            # hidden size == embedding dimension fed to the classifier
NH = 4            # attention heads
DH = H // NH      # head dim
F = 64            # FFN intermediate size
NLAYERS = 2
EPS = 1e-12
C1, C2, C3, NCLS = 256, 64, 16, 2   # classifier head widths
OUT_ROWS, OUT_LANES = 8, 128        # lane-dense padded output block

# rows of the packed per-layer vector slab (8 rows per layer, 3H lanes)
ROW_BQKV, ROW_BO, ROW_LN1G, ROW_LN1B, ROW_B1, ROW_B2, ROW_LN2G, ROW_LN2B = range(8)

assert BS <= H, "activation slab packs (BS)-wide rows into H lanes"


def _gelu(x):
    # tanh-approximation GELU (lowers cleanly to VPU/EUP).
    # TODO(synk): HF BERT uses exact erf GELU; tanh approx differs at ~1e-3.
    return 0.5 * x * (1.0 + jnp.tanh(0.7978845608028654 * (x + 0.044715 * x * x * x)))


def _layernorm(x, gamma, beta):
    mu = jnp.mean(x, axis=-1, keepdims=True)
    var = jnp.mean((x - mu) * (x - mu), axis=-1, keepdims=True)
    return (x - mu) * jax.lax.rsqrt(var + EPS) * gamma + beta


# ---------------- single fused Pallas kernel: encoder stack + pool + MLP -------
def classifier_fwd_kernel(act_ref, lw_ref, vec_ref, cls_ref, out_ref):
    # activation slab: rows [0,BS)=token rows, [BS,2BS)=attn bias, [2BS,2BS+B)=pool
    x = act_ref[0:BS, :]                              # (BS, H) f32
    attn_bias = act_ref[BS:2 * BS, 0:BS]              # (BS, BS) block-diag key mask
    pool = act_ref[2 * BS:2 * BS + B, 0:BS]           # (B, BS) masked-mean matrix
    scale = 1.0 / (float(DH) ** 0.5)

    # -------- frozen encoder stack (statically unrolled, x stays resident) -----
    for l in range(NLAYERS):
        vrow = l * 8
        b_qkv = vec_ref[vrow + ROW_BQKV:vrow + ROW_BQKV + 1, 0:3 * H]   # (1,3H)
        b_o   = vec_ref[vrow + ROW_BO:vrow + ROW_BO + 1, 0:H]
        ln1_g = vec_ref[vrow + ROW_LN1G:vrow + ROW_LN1G + 1, 0:H]
        ln1_b = vec_ref[vrow + ROW_LN1B:vrow + ROW_LN1B + 1, 0:H]
        b1    = vec_ref[vrow + ROW_B1:vrow + ROW_B1 + 1, 0:F]
        b2    = vec_ref[vrow + ROW_B2:vrow + ROW_B2 + 1, 0:H]
        ln2_g = vec_ref[vrow + ROW_LN2G:vrow + ROW_LN2G + 1, 0:H]
        ln2_b = vec_ref[vrow + ROW_LN2B:vrow + ROW_LN2B + 1, 0:H]

        # fused QKV projection for all B*S rows (bf16 weights, f32 accumulate)
        wqkv = lw_ref[l, 0:H, 0:3 * H]                                   # (H,3H) bf16
        qkv = jnp.dot(x.astype(jnp.bfloat16), wqkv,
                      preferred_element_type=jnp.float32) + b_qkv        # (BS,3H) f32
        qkv_bf = qkv.astype(jnp.bfloat16)

        # attention: all sentences at once via block-diagonal additive mask;
        # head outputs folded directly into Wo rows (no lane concat, no kh.T)
        attn_out = jnp.broadcast_to(b_o, (BS, H)).astype(jnp.float32)
        for h in range(NH):
            hlo = h * DH
            qh = qkv_bf[:, hlo:hlo + DH]                                 # (BS,DH)
            kh = qkv_bf[:, H + hlo:H + hlo + DH]
            vh = qkv_bf[:, 2 * H + hlo:2 * H + hlo + DH]
            s = jax.lax.dot_general(qh, kh, (((1,), (1,)), ((), ())),
                                    preferred_element_type=jnp.float32) * scale
            s = s + attn_bias
            s = s - jnp.max(s, axis=-1, keepdims=True)
            p = jnp.exp(s)
            p = p * pl.reciprocal(jnp.sum(p, axis=-1, keepdims=True), approx=True)
            ctx_h = jnp.dot(p.astype(jnp.bfloat16), vh,
                            preferred_element_type=jnp.float32)          # (BS,DH)
            wo_h = lw_ref[l, H + hlo:H + hlo + DH, 0:H]                  # (DH,H) bf16
            attn_out = attn_out + jnp.dot(ctx_h.astype(jnp.bfloat16), wo_h,
                                          preferred_element_type=jnp.float32)

        h1 = _layernorm(x + attn_out, ln1_g, ln1_b)

        w1 = lw_ref[l, 2 * H:3 * H, 0:F]                                 # (H,F) bf16
        w2 = lw_ref[l, 3 * H:3 * H + F, 0:H]                             # (F,H) bf16
        ff = _gelu(jnp.dot(h1.astype(jnp.bfloat16), w1,
                           preferred_element_type=jnp.float32) + b1)
        ff = jnp.dot(ff.astype(jnp.bfloat16), w2,
                     preferred_element_type=jnp.float32) + b2
        x = _layernorm(h1 + ff, ln2_g, ln2_b)

    # -------- masked mean pooling as a single matmul (SBERT-style) -------------
    emb = jnp.dot(pool, x, preferred_element_type=jnp.float32)           # (B, H)

    # -------- classifier MLP head + softmax (dropout = eval-mode no-op) --------
    brow = NLAYERS * 8
    bc1 = vec_ref[brow + 0:brow + 1, 0:C1]
    bc2 = vec_ref[brow + 1:brow + 2, 0:C2]
    bc3 = vec_ref[brow + 2:brow + 3, 0:C3]
    bc4 = vec_ref[brow + 3:brow + 4, 0:NCLS]

    wc1 = cls_ref[0:H, 0:C1]                                             # (H,C1)
    wc2 = cls_ref[H:H + C1, 0:C2]                                        # (C1,C2)
    wc3 = cls_ref[H + C1:H + C1 + C2, 0:C3]                              # (C2,C3)
    wc4 = cls_ref[H + C1 + C2:H + C1 + C2 + C3, 0:NCLS]                  # (C3,NCLS)

    hc = jnp.dot(emb.astype(jnp.bfloat16), wc1, preferred_element_type=jnp.float32)
    hc = jnp.maximum(hc + bc1, 0.0)
    hc = jnp.dot(hc.astype(jnp.bfloat16), wc2, preferred_element_type=jnp.float32)
    hc = jnp.maximum(hc + bc2, 0.0)
    hc = jnp.dot(hc.astype(jnp.bfloat16), wc3, preferred_element_type=jnp.float32)
    hc = jnp.maximum(hc + bc3, 0.0)
    logits = jnp.dot(hc.astype(jnp.bfloat16), wc4,
                     preferred_element_type=jnp.float32) + bc4
    logits = logits - jnp.max(logits, axis=-1, keepdims=True)
    e = jnp.exp(logits)
    probs = e / jnp.sum(e, axis=-1, keepdims=True)

    # single lane-dense padded output block: emb in cols [0,H), probs in [H,H+2)
    out_ref[...] = jnp.zeros((OUT_ROWS, OUT_LANES), jnp.float32)
    out_ref[0:B, 0:H] = emb
    out_ref[0:B, H:H + NCLS] = probs


# ---------------- wrapper -------------------------------------------------------
def classifier_forward(token_ids, attention_mask, params):
    """token_ids: (B,S) int32, attention_mask: (B,S) f32 -> (probs (B,2), emb (B,H))."""
    # JAX glue: embedding gather + position embeddings + embedding LayerNorm.
    tok = jnp.take(params["tok_emb"], token_ids, axis=0)                 # (B,S,H)
    x = tok + params["pos_emb"][None, :, :]
    x = _layernorm(x, params["emb_ln_g"], params["emb_ln_b"])
    x_flat = x.reshape(BS, H)

    mask = attention_mask.astype(jnp.float32)                            # (B, S)
    counts = jnp.maximum(jnp.sum(mask, axis=-1, keepdims=True), 1.0)     # guard 1/0
    seg = jnp.arange(BS, dtype=jnp.int32) // S                           # sentence id per row

    # block-diagonal additive key mask (BS, BS): same sentence AND real key token
    same = seg[:, None] == seg[None, :]
    valid = mask.reshape(-1)[None, :] > 0.0
    attn_bias = jnp.where(jnp.logical_and(same, valid), 0.0, -1e9).astype(jnp.float32)
    attn_bias = jnp.pad(attn_bias, ((0, 0), (0, H - BS)))                # (BS, H)

    # masked-mean pooling matrix P (B, BS): P[b, b*S+s] = mask[b,s]/count[b]
    flat_w = (mask / counts).reshape(-1)                                 # (BS,)
    pool = jnp.where(seg[None, :] == jnp.arange(B, dtype=jnp.int32)[:, None],
                     flat_w[None, :], 0.0)
    pool = jnp.pad(pool, ((0, 0), (0, H - BS)))                          # (B, H)

    act = jnp.concatenate([x_flat, attn_bias, pool], axis=0)             # (2BS+B, H)

    vmem = pl.BlockSpec(memory_space=pltpu.MemorySpace.VMEM)
    out = pl.pallas_call(
        classifier_fwd_kernel,
        out_shape=jax.ShapeDtypeStruct((OUT_ROWS, OUT_LANES), jnp.float32),
        in_specs=[vmem] * 4,
        out_specs=vmem,
    )(act, params["slab_layers"], params["slab_vec"], params["slab_cls"])

    emb = out[0:B, 0:H]
    probs = out[0:B, H:H + NCLS]
    return probs, emb


# ---------------- parameter init (deterministic synthetic "frozen" weights) -----
def init_params(key):
    keys = jax.random.split(key, 3 + NLAYERS)

    def rn(k, shape):
        return 0.02 * jax.random.normal(k, shape, jnp.float32)

    params = {
        "tok_emb": rn(keys[0], (VOCAB, H)),
        "pos_emb": rn(keys[1], (S, H)),
        "emb_ln_g": jnp.ones((1, 1, H), jnp.float32),
        "emb_ln_b": jnp.zeros((1, 1, H), jnp.float32),
    }

    layer_slabs, lvec_rows = [], []
    for l in range(NLAYERS):
        lk = jax.random.split(keys[2 + l], 5)
        wqkv = rn(lk[0], (H, 3 * H))
        wo = rn(lk[1], (H, H))
        w1 = rn(lk[2], (H, F))
        w2 = rn(lk[3], (F, H))
        # row-stacked per-layer weight slab (3H+F rows, 3H lanes)
        slab = jnp.zeros((3 * H + F, 3 * H), jnp.float32)
        slab = slab.at[0:H, 0:3 * H].set(wqkv)
        slab = slab.at[H:2 * H, 0:H].set(wo)
        slab = slab.at[2 * H:3 * H, 0:F].set(w1)
        slab = slab.at[3 * H:3 * H + F, 0:H].set(w2)
        layer_slabs.append(slab)

        vec = rn(lk[4], (8, 3 * H))                                # packed bias/LN rows
        vec = vec.at[ROW_LN1G, :H].set(1.0 + vec[ROW_LN1G, :H])    # LN gammas ~1
        vec = vec.at[ROW_LN2G, :H].set(1.0 + vec[ROW_LN2G, :H])
        lvec_rows.append(vec)

    params["slab_layers"] = jnp.stack(layer_slabs).astype(jnp.bfloat16)  # (NL,3H+F,3H)

    ck = jax.random.split(keys[2 + NLAYERS], 5)
    wc1 = rn(ck[0], (H, C1))
    wc2 = rn(ck[1], (C1, C2))
    wc3 = rn(ck[2], (C2, C3))
    wc4 = rn(ck[3], (C3, NCLS))
    cvec = rn(ck[4], (4, C1))                                      # packed classifier biases

    cls = jnp.zeros((H + C1 + C2 + C3, C1), jnp.float32)
    cls = cls.at[0:H, 0:C1].set(wc1)
    cls = cls.at[H:H + C1, 0:C2].set(wc2)
    cls = cls.at[H + C1:H + C1 + C2, 0:C3].set(wc3)
    cls = cls.at[H + C1 + C2:, 0:NCLS].set(wc4)
    params["slab_cls"] = cls.astype(jnp.bfloat16)                  # (368, 256) bf16

    vecs = jnp.zeros((NLAYERS * 8 + 4, C1), jnp.float32)
    vecs = vecs.at[0:NLAYERS * 8, 0:3 * H].set(jnp.concatenate(lvec_rows, axis=0))
    vecs = vecs.at[NLAYERS * 8:, :].set(cvec)
    params["slab_vec"] = vecs                                      # (20, 256) f32
    return params


if __name__ == "__main__":
    key = jax.random.PRNGKey(0)
    pkey, tkey = jax.random.split(key)
    params = init_params(pkey)

    # Deterministic "tokenized sentences": ids in [1, VOCAB), padded to S.
    token_ids = jax.random.randint(tkey, (B, S), 1, VOCAB, dtype=jnp.int32)
    # Second sentence has 2 padding positions (padding=True semantics).
    attention_mask = jnp.array(
        [[1.0] * S, [1.0] * (S - 2) + [0.0] * 2], dtype=jnp.float32)
    token_ids = token_ids * attention_mask.astype(jnp.int32)       # pad id = 0

    fwd = jax.jit(classifier_forward)
    probs, emb = fwd(token_ids, attention_mask, params)
    jax.block_until_ready((probs, emb))

    assert probs.shape == (B, NCLS) and emb.shape == (B, H)
    assert bool(jnp.all(jnp.isfinite(probs))) and bool(jnp.all(jnp.isfinite(emb)))
    assert bool(jnp.all(jnp.abs(jnp.sum(probs, axis=-1) - 1.0) < 1e-4))
    print("KERNEL_OK")
</pallas_src>

<mosaic_0001>
module attributes {stable_mosaic.version = 11 : i64} {
  func.func @classifier_fwd_kernel(%arg0: memref<34x32xf32, #tpu.memory_space<vmem>>, %arg1: memref<2x160x96xbf16, #tpu.memory_space<vmem>>, %arg2: memref<20x256xf32, #tpu.memory_space<vmem>>, %arg3: memref<368x256xbf16, #tpu.memory_space<vmem>>, %arg4: memref<8x128xf32, #tpu.memory_space<vmem>>) attributes {dimension_semantics = [], scalar_prefetch = 0 : i64, scratch_operands = 0 : i64, tpu.core_type = #tpu.core_type<tc>} {
    %c0 = arith.constant 0 : index
    %c0_0 = arith.constant 0 : index
    %0 = vector.load %arg0[%c0, %c0_0] : memref<34x32xf32, #tpu.memory_space<vmem>>, vector<16x32xf32>
    %c16 = arith.constant 16 : index
    %c0_1 = arith.constant 0 : index
    %1 = vector.load %arg0[%c16, %c0_1] : memref<34x32xf32, #tpu.memory_space<vmem>>, vector<16x16xf32>
    %c32 = arith.constant 32 : index
    %c0_2 = arith.constant 0 : index
    %2 = vector.load %arg0[%c32, %c0_2] : memref<34x32xf32, #tpu.memory_space<vmem>>, vector<2x16xf32>
    %c0_3 = arith.constant 0 : index
    %c0_4 = arith.constant 0 : index
    %3 = vector.load %arg2[%c0_3, %c0_4] : memref<20x256xf32, #tpu.memory_space<vmem>>, vector<1x96xf32>
    %c1 = arith.constant 1 : index
    %c0_5 = arith.constant 0 : index
    %4 = vector.load %arg2[%c1, %c0_5] : memref<20x256xf32, #tpu.memory_space<vmem>>, vector<1x32xf32>
    %c2 = arith.constant 2 : index
    %c0_6 = arith.constant 0 : index
    %5 = vector.load %arg2[%c2, %c0_6] : memref<20x256xf32, #tpu.memory_space<vmem>>, vector<1x32xf32>
    %c3 = arith.constant 3 : index
    %c0_7 = arith.constant 0 : index
    %6 = vector.load %arg2[%c3, %c0_7] : memref<20x256xf32, #tpu.memory_space<vmem>>, vector<1x32xf32>
    %c4 = arith.constant 4 : index
    %c0_8 = arith.constant 0 : index
    %7 = vector.load %arg2[%c4, %c0_8] : memref<20x256xf32, #tpu.memory_space<vmem>>, vector<1x64xf32>
    %c5 = arith.constant 5 : index
    %c0_9 = arith.constant 0 : index
    %8 = vector.load %arg2[%c5, %c0_9] : memref<20x256xf32, #tpu.memory_space<vmem>>, vector<1x32xf32>
    %c6 = arith.constant 6 : index
    %c0_10 = arith.constant 0 : index
    %9 = vector.load %arg2[%c6, %c0_10] : memref<20x256xf32, #tpu.memory_space<vmem>>, vector<1x32xf32>
    %c7 = arith.constant 7 : index
    %c0_11 = arith.constant 0 : index
    %10 = vector.load %arg2[%c7, %c0_11] : memref<20x256xf32, #tpu.memory_space<vmem>>, vector<1x32xf32>
    %c0_12 = arith.constant 0 : index
    %c0_13 = arith.constant 0 : index
    %c0_14 = arith.constant 0 : index
    %11 = vector.load %arg1[%c0_12, %c0_13, %c0_14] : memref<2x160x96xbf16, #tpu.memory_space<vmem>>, vector<1x32x96xbf16>
    %12 = vector.shape_cast %11 : vector<1x32x96xbf16> to vector<32x96xbf16>
    %13 = arith.truncf %0 : vector<16x32xf32> to vector<16x32xbf16>
    %cst = arith.constant dense<0.000000e+00> : vector<16x96xf32>
    %14 = tpu.matmul %13, %12, %cst {dimension_numbers = #tpu.dot_dimension_numbers<[1], [0], [0], [1], [0, 0, 1, 1], [], []>} : vector<16x32xbf16>, vector<32x96xbf16>, vector<16x96xf32> -> vector<16x96xf32>
    %15 = vector.broadcast %3 : vector<1x96xf32> to vector<16x96xf32>
    %16 = arith.addf %14, %15 : vector<16x96xf32>
    %17 = arith.truncf %16 : vector<16x96xf32> to vector<16x96xbf16>
    %18 = vector.shape_cast %4 : vector<1x32xf32> to vector<1x32xf32>
    %19 = vector.broadcast %18 : vector<1x32xf32> to vector<16x32xf32>
    %20 = vector.extract_strided_slice %17 {offsets = [0, 0], sizes = [16, 8], strides = [1, 1]} : vector<16x96xbf16> to vector<16x8xbf16>
    %21 = vector.extract_strided_slice %17 {offsets = [0, 32], sizes = [16, 8], strides = [1, 1]} : vector<16x96xbf16> to vector<16x8xbf16>
    %22 = vector.extract_strided_slice %17 {offsets = [0, 64], sizes = [16, 8], strides = [1, 1]} : vector<16x96xbf16> to vector<16x8xbf16>
    %cst_15 = arith.constant dense<0.000000e+00> : vector<16x16xf32>
    %23 = tpu.matmul %20, %21, %cst_15 {dimension_numbers = #tpu.dot_dimension_numbers<[1], [1], [0], [0], [0, 0, 1, 0], [], []>} : vector<16x8xbf16>, vector<16x8xbf16>, vector<16x16xf32> -> vector<16x16xf32>
    %cst_16 = arith.constant 0.353553385 : f32
    %24 = vector.broadcast %cst_16 : f32 to vector<16x16xf32>
    %25 = arith.mulf %23, %24 : vector<16x16xf32>
    %26 = arith.addf %25, %1 : vector<16x16xf32>
    %cst_17 = arith.constant dense<0xFF800000> : vector<16xf32>
    %27 = vector.multi_reduction <maximumf>, %26, %cst_17 [1] : vector<16x16xf32> to vector<16xf32>
    %28 = vector.shape_cast %27 : vector<16xf32> to vector<16x1xf32>
    %29 = vector.broadcast %28 : vector<16x1xf32> to vector<16x16xf32>
    %30 = arith.subf %26, %29 : vector<16x16xf32>
    %31 = math.exp %30 : vector<16x16xf32>
    %cst_18 = arith.constant dense<0.000000e+00> : vector<16xf32>
    %32 = vector.multi_reduction <add>, %31, %cst_18 [1] : vector<16x16xf32> to vector<16xf32>
    %33 = vector.shape_cast %32 : vector<16xf32> to vector<16x1xf32>
    %34 = tpu.reciprocal %33 {approx = true} : vector<16x1xf32> -> vector<16x1xf32>
    %35 = vector.broadcast %34 : vector<16x1xf32> to vector<16x16xf32>
    %36 = arith.mulf %31, %35 : vector<16x16xf32>
    %37 = arith.truncf %36 : vector<16x16xf32> to vector<16x16xbf16>
    %cst_19 = arith.constant dense<0.000000e+00> : vector<16x8xf32>
    %38 = tpu.matmul %37, %22, %cst_19 {dimension_numbers = #tpu.dot_dimension_numbers<[1], [0], [0], [1], [0, 0, 1, 1], [], []>} : vector<16x16xbf16>, vector<16x8xbf16>, vector<16x8xf32> -> vector<16x8xf32>
    %c0_20 = arith.constant 0 : index
    %c32_21 = arith.constant 32 : index
    %c0_22 = arith.constant 0 : index
    %39 = vector.load %arg1[%c0_20, %c32_21, %c0_22] : memref<2x160x96xbf16, #tpu.memory_space<vmem>>, vector<1x8x32xbf16>
    %40 = vector.shape_cast %39 : vector<1x8x32xbf16> to vector<8x32xbf16>
    %41 = arith.truncf %38 : vector<16x8xf32> to vector<16x8xbf16>
    %cst_23 = arith.constant dense<0.000000e+00> : vector<16x32xf32>
    %42 = tpu.matmul %41, %40, %cst_23 {dimension_numbers = #tpu.dot_dimension_numbers<[1], [0], [0], [1], [0, 0, 1, 1], [], []>} : vector<16x8xbf16>, vector<8x32xbf16>, vector<16x32xf32> -> vector<16x32xf32>
    %43 = arith.addf %19, %42 : vector<16x32xf32>
    %44 = vector.extract_strided_slice %17 {offsets = [0, 8], sizes = [16, 8], strides = [1, 1]} : vector<16x96xbf16> to vector<16x8xbf16>
    %45 = vector.extract_strided_slice %17 {offsets = [0, 40], sizes = [16, 8], strides = [1, 1]} : vector<16x96xbf16> to vector<16x8xbf16>
    %46 = vector.extract_strided_slice %17 {offsets = [0, 72], sizes = [16, 8], strides = [1, 1]} : vector<16x96xbf16> to vector<16x8xbf16>
    %cst_24 = arith.constant dense<0.000000e+00> : vector<16x16xf32>
    %47 = tpu.matmul %44, %45, %cst_24 {dimension_numbers = #tpu.dot_dimension_numbers<[1], [1], [0], [0], [0, 0, 1, 0], [], []>} : vector<16x8xbf16>, vector<16x8xbf16>, vector<16x16xf32> -> vector<16x16xf32>
    %cst_25 = arith.constant 0.353553385 : f32
    %48 = vector.broadcast %cst_25 : f32 to vector<16x16xf32>
    %49 = arith.mulf %47, %48 : vector<16x16xf32>
    %50 = arith.addf %49, %1 : vector<16x16xf32>
    %cst_26 = arith.constant dense<0xFF800000> : vector<16xf32>
    %51 = vector.multi_reduction <maximumf>, %50, %cst_26 [1] : vector<16x16xf32> to vector<16xf32>
    %52 = vector.shape_cast %51 : vector<16xf32> to vector<16x1xf32>
    %53 = vector.broadcast %52 : vector<16x1xf32> to vector<16x16xf32>
    %54 = arith.subf %50, %53 : vector<16x16xf32>
    %55 = math.exp %54 : vector<16x16xf32>
    %cst_27 = arith.constant dense<0.000000e+00> : vector<16xf32>
    %56 = vector.multi_reduction <add>, %55, %cst_27 [1] : vector<16x16xf32> to vector<16xf32>
    %57 = vector.shape_cast %56 : vector<16xf32> to vector<16x1xf32>
    %58 = tpu.reciprocal %57 {approx = true} : vector<16x1xf32> -> vector<16x1xf32>
    %59 = vector.broadcast %58 : vector<16x1xf32> to vector<16x16xf32>
    %60 = arith.mulf %55, %59 : vector<16x16xf32>
    %61 = arith.truncf %60 : vector<16x16xf32> to vector<16x16xbf16>
    %cst_28 = arith.constant dense<0.000000e+00> : vector<16x8xf32>
    %62 = tpu.matmul %61, %46, %cst_28 {dimension_numbers = #tpu.dot_dimension_numbers<[1], [0], [0], [1], [0, 0, 1, 1], [], []>} : vector<16x16xbf16>, vector<16x8xbf16>, vector<16x8xf32> -> vector<16x8xf32>
    %c0_29 = arith.constant 0 : index
    %c40 = arith.constant 40 : index
    %c0_30 = arith.constant 0 : index
    %63 = vector.load %arg1[%c0_29, %c40, %c0_30] : memref<2x160x96xbf16, #tpu.memory_space<vmem>>, vector<1x8x32xbf16>
    %64 = vector.shape_cast %63 : vector<1x8x32xbf16> to vector<8x32xbf16>
    %65 = arith.truncf %62 : vector<16x8xf32> to vector<16x8xbf16>
    %cst_31 = arith.constant dense<0.000000e+00> : vector<16x32xf32>
    %66 = tpu.matmul %65, %64, %cst_31 {dimension_numbers = #tpu.dot_dimension_numbers<[1], [0], [0], [1], [0, 0, 1, 1], [], []>} : vector<16x8xbf16>, vector<8x32xbf16>, vector<16x32xf32> -> vector<16x32xf32>
    %67 = arith.addf %43, %66 : vector<16x32xf32>
    %68 = vector.extract_strided_slice %17 {offsets = [0, 16], sizes = [16, 8], strides = [1, 1]} : vector<16x96xbf16> to vector<16x8xbf16>
    %69 = vector.extract_strided_slice %17 {offsets = [0, 48], sizes = [16, 8], strides = [1, 1]} : vector<16x96xbf16> to vector<16x8xbf16>
    %70 = vector.extract_strided_slice %17 {offsets = [0, 80], sizes = [16, 8], strides = [1, 1]} : vector<16x96xbf16> to vector<16x8xbf16>
    %cst_32 = arith.constant dense<0.000000e+00> : vector<16x16xf32>
    %71 = tpu.matmul %68, %69, %cst_32 {dimension_numbers = #tpu.dot_dimension_numbers<[1], [1], [0], [0], [0, 0, 1, 0], [], []>} : vector<16x8xbf16>, vector<16x8xbf16>, vector<16x16xf32> -> vector<16x16xf32>
    %cst_33 = arith.constant 0.353553385 : f32
    %72 = vector.broadcast %cst_33 : f32 to vector<16x16xf32>
    %73 = arith.mulf %71, %72 : vector<16x16xf32>
    %74 = arith.addf %73, %1 : vector<16x16xf32>
    %cst_34 = arith.constant dense<0xFF800000> : vector<16xf32>
    %75 = vector.multi_reduction <maximumf>, %74, %cst_34 [1] : vector<16x16xf32> to vector<16xf32>
    %76 = vector.shape_cast %75 : vector<16xf32> to vector<16x1xf32>
    %77 = vector.broadcast %76 : vector<16x1xf32> to vector<16x16xf32>
    %78 = arith.subf %74, %77 : vector<16x16xf32>
    %79 = math.exp %78 : vector<16x16xf32>
    %cst_35 = arith.constant dense<0.000000e+00> : vector<16xf32>
    %80 = vector.multi_reduction <add>, %79, %cst_35 [1] : vector<16x16xf32> to vector<16xf32>
    %81 = vector.shape_cast %80 : vector<16xf32> to vector<16x1xf32>
    %82 = tpu.reciprocal %81 {approx = true} : vector<16x1xf32> -> vector<16x1xf32>
    %83 = vector.broadcast %82 : vector<16x1xf32> to vector<16x16xf32>
    %84 = arith.mulf %79, %83 : vector<16x16xf32>
    %85 = arith.truncf %84 : vector<16x16xf32> to vector<16x16xbf16>
    %cst_36 = arith.constant dense<0.000000e+00> : vector<16x8xf32>
    %86 = tpu.matmul %85, %70, %cst_36 {dimension_numbers = #tpu.dot_dimension_numbers<[1], [0], [0], [1], [0, 0, 1, 1], [], []>} : vector<16x16xbf16>, vector<16x8xbf16>, vector<16x8xf32> -> vector<16x8xf32>
    %c0_37 = arith.constant 0 : index
    %c48 = arith.constant 48 : index
    %c0_38 = arith.constant 0 : index
    %87 = vector.load %arg1[%c0_37, %c48, %c0_38] : memref<2x160x96xbf16, #tpu.memory_space<vmem>>, vector<1x8x32xbf16>
    %88 = vector.shape_cast %87 : vector<1x8x32xbf16> to vector<8x32xbf16>
    %89 = arith.truncf %86 : vector<16x8xf32> to vector<16x8xbf16>
    %cst_39 = arith.constant dense<0.000000e+00> : vector<16x32xf32>
    %90 = tpu.matmul %89, %88, %cst_39 {dimension_numbers = #tpu.dot_dimension_numbers<[1], [0], [0], [1], [0, 0, 1, 1], [], []>} : vector<16x8xbf16>, vector<8x32xbf16>, vector<16x32xf32> -> vector<16x32xf32>
    %91 = arith.addf %67, %90 : vector<16x32xf32>
    %92 = vector.extract_strided_slice %17 {offsets = [0, 24], sizes = [16, 8], strides = [1, 1]} : vector<16x96xbf16> to vector<16x8xbf16>
    %93 = vector.extract_strided_slice %17 {offsets = [0, 56], sizes = [16, 8], strides = [1, 1]} : vector<16x96xbf16> to vector<16x8xbf16>
    %94 = vector.extract_strided_slice %17 {offsets = [0, 88], sizes = [16, 8], strides = [1, 1]} : vector<16x96xbf16> to vector<16x8xbf16>
    %cst_40 = arith.constant dense<0.000000e+00> : vector<16x16xf32>
    %95 = tpu.matmul %92, %93, %cst_40 {dimension_numbers = #tpu.dot_dimension_numbers<[1], [1], [0], [0], [0, 0, 1, 0], [], []>} : vector<16x8xbf16>, vector<16x8xbf16>, vector<16x16xf32> -> vector<16x16xf32>
    %cst_41 = arith.constant 0.353553385 : f32
    %96 = vector.broadcast %cst_41 : f32 to vector<16x16xf32>
    %97 = arith.mulf %95, %96 : vector<16x16xf32>
    %98 = arith.addf %97, %1 : vector<16x16xf32>
    %cst_42 = arith.constant dense<0xFF800000> : vector<16xf32>
    %99 = vector.multi_reduction <maximumf>, %98, %cst_42 [1] : vector<16x16xf32> to vector<16xf32>
    %100 = vector.shape_cast %99 : vector<16xf32> to vector<16x1xf32>
    %101 = vector.broadcast %100 : vector<16x1xf32> to vector<16x16xf32>
    %102 = arith.subf %98, %101 : vector<16x16xf32>
    %103 = math.exp %102 : vector<16x16xf32>
    %cst_43 = arith.constant dense<0.000000e+00> : vector<16xf32>
    %104 = vector.multi_reduction <add>, %103, %cst_43 [1] : vector<16x16xf32> to vector<16xf32>
    %105 = vector.shape_cast %104 : vector<16xf32> to vector<16x1xf32>
    %106 = tpu.reciprocal %105 {approx = true} : vector<16x1xf32> -> vector<16x1xf32>
    %107 = vector.broadcast %106 : vector<16x1xf32> to vector<16x16xf32>
    %108 = arith.mulf %103, %107 : vector<16x16xf32>
    %109 = arith.truncf %108 : vector<16x16xf32> to vector<16x16xbf16>
    %cst_44 = arith.constant dense<0.000000e+00> : vector<16x8xf32>
    %110 = tpu.matmul %109, %94, %cst_44 {dimension_numbers = #tpu.dot_dimension_numbers<[1], [0], [0], [1], [0, 0, 1, 1], [], []>} : vector<16x16xbf16>, vector<16x8xbf16>, vector<16x8xf32> -> vector<16x8xf32>
    %c0_45 = arith.constant 0 : index
    %c56 = arith.constant 56 : index
    %c0_46 = arith.constant 0 : index
    %111 = vector.load %arg1[%c0_45, %c56, %c0_46] : memref<2x160x96xbf16, #tpu.memory_space<vmem>>, vector<1x8x32xbf16>
    %112 = vector.shape_cast %111 : vector<1x8x32xbf16> to vector<8x32xbf16>
    %113 = arith.truncf %110 : vector<16x8xf32> to vector<16x8xbf16>
    %cst_47 = arith.constant dense<0.000000e+00> : vector<16x32xf32>
    %114 = tpu.matmul %113, %112, %cst_47 {dimension_numbers = #tpu.dot_dimension_numbers<[1], [0], [0], [1], [0, 0, 1, 1], [], []>} : vector<16x8xbf16>, vector<8x32xbf16>, vector<16x32xf32> -> vector<16x32xf32>
    %115 = arith.addf %91, %114 : vector<16x32xf32>
    %116 = arith.addf %0, %115 : vector<16x32xf32>
    %cst_48 = arith.constant dense<0.000000e+00> : vector<16xf32>
    %117 = vector.multi_reduction <add>, %116, %cst_48 [1] : vector<16x32xf32> to vector<16xf32>
    %118 = vector.shape_cast %117 : vector<16xf32> to vector<16x1xf32>
    %cst_49 = arith.constant 3.200000e+01 : f32
    %119 = vector.broadcast %cst_49 : f32 to vector<16x1xf32>
    %120 = arith.divf %118, %119 : vector<16x1xf32>
    %121 = vector.broadcast %120 : vector<16x1xf32> to vector<16x32xf32>
    %122 = arith.subf %116, %121 : vector<16x32xf32>
    %123 = vector.broadcast %120 : vector<16x1xf32> to vector<16x32xf32>
    %124 = arith.subf %116, %123 : vector<16x32xf32>
    %125 = arith.mulf %122, %124 : vector<16x32xf32>
    %cst_50 = arith.constant dense<0.000000e+00> : vector<16xf32>
    %126 = vector.multi_reduction <add>, %125, %cst_50 [1] : vector<16x32xf32> to vector<16xf32>
    %127 = vector.shape_cast %126 : vector<16xf32> to vector<16x1xf32>
    %cst_51 = arith.constant 3.200000e+01 : f32
    %128 = vector.broadcast %cst_51 : f32 to vector<16x1xf32>
    %129 = arith.divf %127, %128 : vector<16x1xf32>
    %130 = vector.broadcast %120 : vector<16x1xf32> to vector<16x32xf32>
    %131 = arith.subf %116, %130 : vector<16x32xf32>
    %cst_52 = arith.constant 9.99999996E-13 : f32
    %132 = vector.broadcast %cst_52 : f32 to vector<16x1xf32>
    %133 = arith.addf %129, %132 : vector<16x1xf32>
    %134 = math.rsqrt %133 : vector<16x1xf32>
    %135 = vector.broadcast %134 : vector<16x1xf32> to vector<16x32xf32>
    %136 = arith.mulf %131, %135 : vector<16x32xf32>
    %137 = vector.broadcast %5 : vector<1x32xf32> to vector<16x32xf32>
    %138 = arith.mulf %136, %137 : vector<16x32xf32>
    %139 = vector.broadcast %6 : vector<1x32xf32> to vector<16x32xf32>
    %140 = arith.addf %138, %139 : vector<16x32xf32>
    %c0_53 = arith.constant 0 : index
    %c64 = arith.constant 64 : index
    %c0_54 = arith.constant 0 : index
    %141 = vector.load %arg1[%c0_53, %c64, %c0_54] : memref<2x160x96xbf16, #tpu.memory_space<vmem>>, vector<1x32x64xbf16>
    %142 = vector.shape_cast %141 : vector<1x32x64xbf16> to vector<32x64xbf16>
    %c0_55 = arith.constant 0 : index
    %c96 = arith.constant 96 : index
    %c0_56 = arith.constant 0 : index
    %143 = vector.load %arg1[%c0_55, %c96, %c0_56] : memref<2x160x96xbf16, #tpu.memory_space<vmem>>, vector<1x64x32xbf16>
    %144 = vector.shape_cast %143 : vector<1x64x32xbf16> to vector<64x32xbf16>
    %145 = arith.truncf %140 : vector<16x32xf32> to vector<16x32xbf16>
    %cst_57 = arith.constant dense<0.000000e+00> : vector<16x64xf32>
    %146 = tpu.matmul %145, %142, %cst_57 {dimension_numbers = #tpu.dot_dimension_numbers<[1], [0], [0], [1], [0, 0, 1, 1], [], []>} : vector<16x32xbf16>, vector<32x64xbf16>, vector<16x64xf32> -> vector<16x64xf32>
    %147 = vector.broadcast %7 : vector<1x64xf32> to vector<16x64xf32>
    %148 = arith.addf %146, %147 : vector<16x64xf32>
    %cst_58 = arith.constant 5.000000e-01 : f32
    %149 = vector.broadcast %cst_58 : f32 to vector<16x64xf32>
    %150 = arith.mulf %149, %148 : vector<16x64xf32>
    %cst_59 = arith.constant 4.471500e-02 : f32
    %151 = vector.broadcast %cst_59 : f32 to vector<16x64xf32>
    %152 = arith.mulf %151, %148 : vector<16x64xf32>
    %153 = arith.mulf %152, %148 : vector<16x64xf32>
    %154 = arith.mulf %153, %148 : vector<16x64xf32>
    %155 = arith.addf %148, %154 : vector<16x64xf32>
    %cst_60 = arith.constant 0.797884583 : f32
    %156 = vector.broadcast %cst_60 : f32 to vector<16x64xf32>
    %157 = arith.mulf %156, %155 : vector<16x64xf32>
    %158 = math.tanh %157 : vector<16x64xf32>
    %cst_61 = arith.constant 1.000000e+00 : f32
    %159 = vector.broadcast %cst_61 : f32 to vector<16x64xf32>
    %160 = arith.addf %159, %158 : vector<16x64xf32>
    %161 = arith.mulf %150, %160 : vector<16x64xf32>
    %162 = arith.truncf %161 : vector<16x64xf32> to vector<16x64xbf16>
    %cst_62 = arith.constant dense<0.000000e+00> : vector<16x32xf32>
    %163 = tpu.matmul %162, %144, %cst_62 {dimension_numbers = #tpu.dot_dimension_numbers<[1], [0], [0], [1], [0, 0, 1, 1], [], []>} : vector<16x64xbf16>, vector<64x32xbf16>, vector<16x32xf32> -> vector<16x32xf32>
    %164 = vector.broadcast %8 : vector<1x32xf32> to vector<16x32xf32>
    %165 = arith.addf %163, %164 : vector<16x32xf32>
    %166 = arith.addf %140, %165 : vector<16x32xf32>
    %cst_63 = arith.constant dense<0.000000e+00> : vector<16xf32>
    %167 = vector.multi_reduction <add>, %166, %cst_63 [1] : vector<16x32xf32> to vector<16xf32>
    %168 = vector.shape_cast %167 : vector<16xf32> to vector<16x1xf32>
    %cst_64 = arith.constant 3.200000e+01 : f32
    %169 = vector.broadcast %cst_64 : f32 to vector<16x1xf32>
    %170 = arith.divf %168, %169 : vector<16x1xf32>
    %171 = vector.broadcast %170 : vector<16x1xf32> to vector<16x32xf32>
    %172 = arith.subf %166, %171 : vector<16x32xf32>
    %173 = vector.broadcast %170 : vector<16x1xf32> to vector<16x32xf32>
    %174 = arith.subf %166, %173 : vector<16x32xf32>
    %175 = arith.mulf %172, %174 : vector<16x32xf32>
    %cst_65 = arith.constant dense<0.000000e+00> : vector<16xf32>
    %176 = vector.multi_reduction <add>, %175, %cst_65 [1] : vector<16x32xf32> to vector<16xf32>
    %177 = vector.shape_cast %176 : vector<16xf32> to vector<16x1xf32>
    %cst_66 = arith.constant 3.200000e+01 : f32
    %178 = vector.broadcast %cst_66 : f32 to vector<16x1xf32>
    %179 = arith.divf %177, %178 : vector<16x1xf32>
    %180 = vector.broadcast %170 : vector<16x1xf32> to vector<16x32xf32>
    %181 = arith.subf %166, %180 : vector<16x32xf32>
    %cst_67 = arith.constant 9.99999996E-13 : f32
    %182 = vector.broadcast %cst_67 : f32 to vector<16x1xf32>
    %183 = arith.addf %179, %182 : vector<16x1xf32>
    %184 = math.rsqrt %183 : vector<16x1xf32>
    %185 = vector.broadcast %184 : vector<16x1xf32> to vector<16x32xf32>
    %186 = arith.mulf %181, %185 : vector<16x32xf32>
    %187 = vector.broadcast %9 : vector<1x32xf32> to vector<16x32xf32>
    %188 = arith.mulf %186, %187 : vector<16x32xf32>
    %189 = vector.broadcast %10 : vector<1x32xf32> to vector<16x32xf32>
    %190 = arith.addf %188, %189 : vector<16x32xf32>
    %c8 = arith.constant 8 : index
    %c0_68 = arith.constant 0 : index
    %191 = vector.load %arg2[%c8, %c0_68] : memref<20x256xf32, #tpu.memory_space<vmem>>, vector<1x96xf32>
    %c9 = arith.constant 9 : index
    %c0_69 = arith.constant 0 : index
    %192 = vector.load %arg2[%c9, %c0_69] : memref<20x256xf32, #tpu.memory_space<vmem>>, vector<1x32xf32>
    %c10 = arith.constant 10 : index
    %c0_70 = arith.constant 0 : index
    %193 = vector.load %arg2[%c10, %c0_70] : memref<20x256xf32, #tpu.memory_space<vmem>>, vector<1x32xf32>
    %c11 = arith.constant 11 : index
    %c0_71 = arith.constant 0 : index
    %194 = vector.load %arg2[%c11, %c0_71] : memref<20x256xf32, #tpu.memory_space<vmem>>, vector<1x32xf32>
    %c12 = arith.constant 12 : index
    %c0_72 = arith.constant 0 : index
    %195 = vector.load %arg2[%c12, %c0_72] : memref<20x256xf32, #tpu.memory_space<vmem>>, vector<1x64xf32>
    %c13 = arith.constant 13 : index
    %c0_73 = arith.constant 0 : index
    %196 = vector.load %arg2[%c13, %c0_73] : memref<20x256xf32, #tpu.memory_space<vmem>>, vector<1x32xf32>
    %c14 = arith.constant 14 : index
    %c0_74 = arith.constant 0 : index
    %197 = vector.load %arg2[%c14, %c0_74] : memref<20x256xf32, #tpu.memory_space<vmem>>, vector<1x32xf32>
    %c15 = arith.constant 15 : index
    %c0_75 = arith.constant 0 : index
    %198 = vector.load %arg2[%c15, %c0_75] : memref<20x256xf32, #tpu.memory_space<vmem>>, vector<1x32xf32>
    %c1_76 = arith.constant 1 : index
    %c0_77 = arith.constant 0 : index
    %c0_78 = arith.constant 0 : index
    %199 = vector.load %arg1[%c1_76, %c0_77, %c0_78] : memref<2x160x96xbf16, #tpu.memory_space<vmem>>, vector<1x32x96xbf16>
    %200 = vector.shape_cast %199 : vector<1x32x96xbf16> to vector<32x96xbf16>
    %201 = arith.truncf %190 : vector<16x32xf32> to vector<16x32xbf16>
    %cst_79 = arith.constant dense<0.000000e+00> : vector<16x96xf32>
    %202 = tpu.matmul %201, %200, %cst_79 {dimension_numbers = #tpu.dot_dimension_numbers<[1], [0], [0], [1], [0, 0, 1, 1], [], []>} : vector<16x32xbf16>, vector<32x96xbf16>, vector<16x96xf32> -> vector<16x96xf32>
    %203 = vector.broadcast %191 : vector<1x96xf32> to vector<16x96xf32>
    %204 = arith.addf %202, %203 : vector<16x96xf32>
    %205 = arith.truncf %204 : vector<16x96xf32> to vector<16x96xbf16>
    %206 = vector.shape_cast %192 : vector<1x32xf32> to vector<1x32xf32>
    %207 = vector.broadcast %206 : vector<1x32xf32> to vector<16x32xf32>
    %208 = vector.extract_strided_slice %205 {offsets = [0, 0], sizes = [16, 8], strides = [1, 1]} : vector<16x96xbf16> to vector<16x8xbf16>
    %209 = vector.extract_strided_slice %205 {offsets = [0, 32], sizes = [16, 8], strides = [1, 1]} : vector<16x96xbf16> to vector<16x8xbf16>
    %210 = vector.extract_strided_slice %205 {offsets = [0, 64], sizes = [16, 8], strides = [1, 1]} : vector<16x96xbf16> to vector<16x8xbf16>
    %cst_80 = arith.constant dense<0.000000e+00> : vector<16x16xf32>
    %211 = tpu.matmul %208, %209, %cst_80 {dimension_numbers = #tpu.dot_dimension_numbers<[1], [1], [0], [0], [0, 0, 1, 0], [], []>} : vector<16x8xbf16>, vector<16x8xbf16>, vector<16x16xf32> -> vector<16x16xf32>
    %cst_81 = arith.constant 0.353553385 : f32
    %212 = vector.broadcast %cst_81 : f32 to vector<16x16xf32>
    %213 = arith.mulf %211, %212 : vector<16x16xf32>
    %214 = arith.addf %213, %1 : vector<16x16xf32>
    %cst_82 = arith.constant dense<0xFF800000> : vector<16xf32>
    %215 = vector.multi_reduction <maximumf>, %214, %cst_82 [1] : vector<16x16xf32> to vector<16xf32>
    %216 = vector.shape_cast %215 : vector<16xf32> to vector<16x1xf32>
    %217 = vector.broadcast %216 : vector<16x1xf32> to vector<16x16xf32>
    %218 = arith.subf %214, %217 : vector<16x16xf32>
    %219 = math.exp %218 : vector<16x16xf32>
    %cst_83 = arith.constant dense<0.000000e+00> : vector<16xf32>
    %220 = vector.multi_reduction <add>, %219, %cst_83 [1] : vector<16x16xf32> to vector<16xf32>
    %221 = vector.shape_cast %220 : vector<16xf32> to vector<16x1xf32>
    %222 = tpu.reciprocal %221 {approx = true} : vector<16x1xf32> -> vector<16x1xf32>
    %223 = vector.broadcast %222 : vector<16x1xf32> to vector<16x16xf32>
    %224 = arith.mulf %219, %223 : vector<16x16xf32>
    %225 = arith.truncf %224 : vector<16x16xf32> to vector<16x16xbf16>
    %cst_84 = arith.constant dense<0.000000e+00> : vector<16x8xf32>
    %226 = tpu.matmul %225, %210, %cst_84 {dimension_numbers = #tpu.dot_dimension_numbers<[1], [0], [0], [1], [0, 0, 1, 1], [], []>} : vector<16x16xbf16>, vector<16x8xbf16>, vector<16x8xf32> -> vector<16x8xf32>
    %c1_85 = arith.constant 1 : index
    %c32_86 = arith.constant 32 : index
    %c0_87 = arith.constant 0 : index
    %227 = vector.load %arg1[%c1_85, %c32_86, %c0_87] : memref<2x160x96xbf16, #tpu.memory_space<vmem>>, vector<1x8x32xbf16>
    %228 = vector.shape_cast %227 : vector<1x8x32xbf16> to vector<8x32xbf16>
    %229 = arith.truncf %226 : vector<16x8xf32> to vector<16x8xbf16>
    %cst_88 = arith.constant dense<0.000000e+00> : vector<16x32xf32>
    %230 = tpu.matmul %229, %228, %cst_88 {dimension_numbers = #tpu.dot_dimension_numbers<[1], [0], [0], [1], [0, 0, 1, 1], [], []>} : vector<16x8xbf16>, vector<8x32xbf16>, vector<16x32xf32> -> vector<16x32xf32>
    %231 = arith.addf %207, %230 : vector<16x32xf32>
    %232 = vector.extract_strided_slice %205 {offsets = [0, 8], sizes = [16, 8], strides = [1, 1]} : vector<16x96xbf16> to vector<16x8xbf16>
    %233 = vector.extract_strided_slice %205 {offsets = [0, 40], sizes = [16, 8], strides = [1, 1]} : vector<16x96xbf16> to vector<16x8xbf16>
    %234 = vector.extract_strided_slice %205 {offsets = [0, 72], sizes = [16, 8], strides = [1, 1]} : vector<16x96xbf16> to vector<16x8xbf16>
    %cst_89 = arith.constant dense<0.000000e+00> : vector<16x16xf32>
    %235 = tpu.matmul %232, %233, %cst_89 {dimension_numbers = #tpu.dot_dimension_numbers<[1], [1], [0], [0], [0, 0, 1, 0], [], []>} : vector<16x8xbf16>, vector<16x8xbf16>, vector<16x16xf32> -> vector<16x16xf32>
    %cst_90 = arith.constant 0.353553385 : f32
    %236 = vector.broadcast %cst_90 : f32 to vector<16x16xf32>
    %237 = arith.mulf %235, %236 : vector<16x16xf32>
    %238 = arith.addf %237, %1 : vector<16x16xf32>
    %cst_91 = arith.constant dense<0xFF800000> : vector<16xf32>
    %239 = vector.multi_reduction <maximumf>, %238, %cst_91 [1] : vector<16x16xf32> to vector<16xf32>
    %240 = vector.shape_cast %239 : vector<16xf32> to vector<16x1xf32>
    %241 = vector.broadcast %240 : vector<16x1xf32> to vector<16x16xf32>
    %242 = arith.subf %238, %241 : vector<16x16xf32>
    %243 = math.exp %242 : vector<16x16xf32>
    %cst_92 = arith.constant dense<0.000000e+00> : vector<16xf32>
    %244 = vector.multi_reduction <add>, %243, %cst_92 [1] : vector<16x16xf32> to vector<16xf32>
    %245 = vector.shape_cast %244 : vector<16xf32> to vector<16x1xf32>
    %246 = tpu.reciprocal %245 {approx = true} : vector<16x1xf32> -> vector<16x1xf32>
    %247 = vector.broadcast %246 : vector<16x1xf32> to vector<16x16xf32>
    %248 = arith.mulf %243, %247 : vector<16x16xf32>
    %249 = arith.truncf %248 : vector<16x16xf32> to vector<16x16xbf16>
    %cst_93 = arith.constant dense<0.000000e+00> : vector<16x8xf32>
    %250 = tpu.matmul %249, %234, %cst_93 {dimension_numbers = #tpu.dot_dimension_numbers<[1], [0], [0], [1], [0, 0, 1, 1], [], []>} : vector<16x16xbf16>, vector<16x8xbf16>, vector<16x8xf32> -> vector<16x8xf32>
    %c1_94 = arith.constant 1 : index
    %c40_95 = arith.constant 40 : index
    %c0_96 = arith.constant 0 : index
    %251 = vector.load %arg1[%c1_94, %c40_95, %c0_96] : memref<2x160x96xbf16, #tpu.memory_space<vmem>>, vector<1x8x32xbf16>
    %252 = vector.shape_cast %251 : vector<1x8x32xbf16> to vector<8x32xbf16>
    %253 = arith.truncf %250 : vector<16x8xf32> to vector<16x8xbf16>
    %cst_97 = arith.constant dense<0.000000e+00> : vector<16x32xf32>
    %254 = tpu.matmul %253, %252, %cst_97 {dimension_numbers = #tpu.dot_dimension_numbers<[1], [0], [0], [1], [0, 0, 1, 1], [], []>} : vector<16x8xbf16>, vector<8x32xbf16>, vector<16x32xf32> -> vector<16x32xf32>
    %255 = arith.addf %231, %254 : vector<16x32xf32>
    %256 = vector.extract_strided_slice %205 {offsets = [0, 16], sizes = [16, 8], strides = [1, 1]} : vector<16x96xbf16> to vector<16x8xbf16>
    %257 = vector.extract_strided_slice %205 {offsets = [0, 48], sizes = [16, 8], strides = [1, 1]} : vector<16x96xbf16> to vector<16x8xbf16>
    %258 = vector.extract_strided_slice %205 {offsets = [0, 80], sizes = [16, 8], strides = [1, 1]} : vector<16x96xbf16> to vector<16x8xbf16>
    %cst_98 = arith.constant dense<0.000000e+00> : vector<16x16xf32>
    %259 = tpu.matmul %256, %257, %cst_98 {dimension_numbers = #tpu.dot_dimension_numbers<[1], [1], [0], [0], [0, 0, 1, 0], [], []>} : vector<16x8xbf16>, vector<16x8xbf16>, vector<16x16xf32> -> vector<16x16xf32>
    %cst_99 = arith.constant 0.353553385 : f32
    %260 = vector.broadcast %cst_99 : f32 to vector<16x16xf32>
    %261 = arith.mulf %259, %260 : vector<16x16xf32>
    %262 = arith.addf %261, %1 : vector<16x16xf32>
    %cst_100 = arith.constant dense<0xFF800000> : vector<16xf32>
    %263 = vector.multi_reduction <maximumf>, %262, %cst_100 [1] : vector<16x16xf32> to vector<16xf32>
    %264 = vector.shape_cast %263 : vector<16xf32> to vector<16x1xf32>
    %265 = vector.broadcast %264 : vector<16x1xf32> to vector<16x16xf32>
    %266 = arith.subf %262, %265 : vector<16x16xf32>
    %267 = math.exp %266 : vector<16x16xf32>
    %cst_101 = arith.constant dense<0.000000e+00> : vector<16xf32>
    %268 = vector.multi_reduction <add>, %267, %cst_101 [1] : vector<16x16xf32> to vector<16xf32>
    %269 = vector.shape_cast %268 : vector<16xf32> to vector<16x1xf32>
    %270 = tpu.reciprocal %269 {approx = true} : vector<16x1xf32> -> vector<16x1xf32>
    %271 = vector.broadcast %270 : vector<16x1xf32> to vector<16x16xf32>
    %272 = arith.mulf %267, %271 : vector<16x16xf32>
    %273 = arith.truncf %272 : vector<16x16xf32> to vector<16x16xbf16>
    %cst_102 = arith.constant dense<0.000000e+00> : vector<16x8xf32>
    %274 = tpu.matmul %273, %258, %cst_102 {dimension_numbers = #tpu.dot_dimension_numbers<[1], [0], [0], [1], [0, 0, 1, 1], [], []>} : vector<16x16xbf16>, vector<16x8xbf16>, vector<16x8xf32> -> vector<16x8xf32>
    %c1_103 = arith.constant 1 : index
    %c48_104 = arith.constant 48 : index
    %c0_105 = arith.constant 0 : index
    %275 = vector.load %arg1[%c1_103, %c48_104, %c0_105] : memref<2x160x96xbf16, #tpu.memory_space<vmem>>, vector<1x8x32xbf16>
    %276 = vector.shape_cast %275 : vector<1x8x32xbf16> to vector<8x32xbf16>
    %277 = arith.truncf %274 : vector<16x8xf32> to vector<16x8xbf16>
    %cst_106 = arith.constant dense<0.000000e+00> : vector<16x32xf32>
    %278 = tpu.matmul %277, %276, %cst_106 {dimension_numbers = #tpu.dot_dimension_numbers<[1], [0], [0], [1], [0, 0, 1, 1], [], []>} : vector<16x8xbf16>, vector<8x32xbf16>, vector<16x32xf32> -> vector<16x32xf32>
    %279 = arith.addf %255, %278 : vector<16x32xf32>
    %280 = vector.extract_strided_slice %205 {offsets = [0, 24], sizes = [16, 8], strides = [1, 1]} : vector<16x96xbf16> to vector<16x8xbf16>
    %281 = vector.extract_strided_slice %205 {offsets = [0, 56], sizes = [16, 8], strides = [1, 1]} : vector<16x96xbf16> to vector<16x8xbf16>
    %282 = vector.extract_strided_slice %205 {offsets = [0, 88], sizes = [16, 8], strides = [1, 1]} : vector<16x96xbf16> to vector<16x8xbf16>
    %cst_107 = arith.constant dense<0.000000e+00> : vector<16x16xf32>
    %283 = tpu.matmul %280, %281, %cst_107 {dimension_numbers = #tpu.dot_dimension_numbers<[1], [1], [0], [0], [0, 0, 1, 0], [], []>} : vector<16x8xbf16>, vector<16x8xbf16>, vector<16x16xf32> -> vector<16x16xf32>
    %cst_108 = arith.constant 0.353553385 : f32
    %284 = vector.broadcast %cst_108 : f32 to vector<16x16xf32>
    %285 = arith.mulf %283, %284 : vector<16x16xf32>
    %286 = arith.addf %285, %1 : vector<16x16xf32>
    %cst_109 = arith.constant dense<0xFF800000> : vector<16xf32>
    %287 = vector.multi_reduction <maximumf>, %286, %cst_109 [1] : vector<16x16xf32> to vector<16xf32>
    %288 = vector.shape_cast %287 : vector<16xf32> to vector<16x1xf32>
    %289 = vector.broadcast %288 : vector<16x1xf32> to vector<16x16xf32>
    %290 = arith.subf %286, %289 : vector<16x16xf32>
    %291 = math.exp %290 : vector<16x16xf32>
    %cst_110 = arith.constant dense<0.000000e+00> : vector<16xf32>
    %292 = vector.multi_reduction <add>, %291, %cst_110 [1] : vector<16x16xf32> to vector<16xf32>
    %293 = vector.shape_cast %292 : vector<16xf32> to vector<16x1xf32>
    %294 = tpu.reciprocal %293 {approx = true} : vector<16x1xf32> -> vector<16x1xf32>
    %295 = vector.broadcast %294 : vector<16x1xf32> to vector<16x16xf32>
    %296 = arith.mulf %291, %295 : vector<16x16xf32>
    %297 = arith.truncf %296 : vector<16x16xf32> to vector<16x16xbf16>
    %cst_111 = arith.constant dense<0.000000e+00> : vector<16x8xf32>
    %298 = tpu.matmul %297, %282, %cst_111 {dimension_numbers = #tpu.dot_dimension_numbers<[1], [0], [0], [1], [0, 0, 1, 1], [], []>} : vector<16x16xbf16>, vector<16x8xbf16>, vector<16x8xf32> -> vector<16x8xf32>
    %c1_112 = arith.constant 1 : index
    %c56_113 = arith.constant 56 : index
    %c0_114 = arith.constant 0 : index
    %299 = vector.load %arg1[%c1_112, %c56_113, %c0_114] : memref<2x160x96xbf16, #tpu.memory_space<vmem>>, vector<1x8x32xbf16>
    %300 = vector.shape_cast %299 : vector<1x8x32xbf16> to vector<8x32xbf16>
    %301 = arith.truncf %298 : vector<16x8xf32> to vector<16x8xbf16>
    %cst_115 = arith.constant dense<0.000000e+00> : vector<16x32xf32>
    %302 = tpu.matmul %301, %300, %cst_115 {dimension_numbers = #tpu.dot_dimension_numbers<[1], [0], [0], [1], [0, 0, 1, 1], [], []>} : vector<16x8xbf16>, vector<8x32xbf16>, vector<16x32xf32> -> vector<16x32xf32>
    %303 = arith.addf %279, %302 : vector<16x32xf32>
    %304 = arith.addf %190, %303 : vector<16x32xf32>
    %cst_116 = arith.constant dense<0.000000e+00> : vector<16xf32>
    %305 = vector.multi_reduction <add>, %304, %cst_116 [1] : vector<16x32xf32> to vector<16xf32>
    %306 = vector.shape_cast %305 : vector<16xf32> to vector<16x1xf32>
    %cst_117 = arith.constant 3.200000e+01 : f32
    %307 = vector.broadcast %cst_117 : f32 to vector<16x1xf32>
    %308 = arith.divf %306, %307 : vector<16x1xf32>
    %309 = vector.broadcast %308 : vector<16x1xf32> to vector<16x32xf32>
    %310 = arith.subf %304, %309 : vector<16x32xf32>
    %311 = vector.broadcast %308 : vector<16x1xf32> to vector<16x32xf32>
    %312 = arith.subf %304, %311 : vector<16x32xf32>
    %313 = arith.mulf %310, %312 : vector<16x32xf32>
    %cst_118 = arith.constant dense<0.000000e+00> : vector<16xf32>
    %314 = vector.multi_reduction <add>, %313, %cst_118 [1] : vector<16x32xf32> to vector<16xf32>
    %315 = vector.shape_cast %314 : vector<16xf32> to vector<16x1xf32>
    %cst_119 = arith.constant 3.200000e+01 : f32
    %316 = vector.broadcast %cst_119 : f32 to vector<16x1xf32>
    %317 = arith.divf %315, %316 : vector<16x1xf32>
    %318 = vector.broadcast %308 : vector<16x1xf32> to vector<16x32xf32>
    %319 = arith.subf %304, %318 : vector<16x32xf32>
    %cst_120 = arith.constant 9.99999996E-13 : f32
    %320 = vector.broadcast %cst_120 : f32 to vector<16x1xf32>
    %321 = arith.addf %317, %320 : vector<16x1xf32>
    %322 = math.rsqrt %321 : vector<16x1xf32>
    %323 = vector.broadcast %322 : vector<16x1xf32> to vector<16x32xf32>
    %324 = arith.mulf %319, %323 : vector<16x32xf32>
    %325 = vector.broadcast %193 : vector<1x32xf32> to vector<16x32xf32>
    %326 = arith.mulf %324, %325 : vector<16x32xf32>
    %327 = vector.broadcast %194 : vector<1x32xf32> to vector<16x32xf32>
    %328 = arith.addf %326, %327 : vector<16x32xf32>
    %c1_121 = arith.constant 1 : index
    %c64_122 = arith.constant 64 : index
    %c0_123 = arith.constant 0 : index
    %329 = vector.load %arg1[%c1_121, %c64_122, %c0_123] : memref<2x160x96xbf16, #tpu.memory_space<vmem>>, vector<1x32x64xbf16>
    %330 = vector.shape_cast %329 : vector<1x32x64xbf16> to vector<32x64xbf16>
    %c1_124 = arith.constant 1 : index
    %c96_125 = arith.constant 96 : index
    %c0_126 = arith.constant 0 : index
    %331 = vector.load %arg1[%c1_124, %c96_125, %c0_126] : memref<2x160x96xbf16, #tpu.memory_space<vmem>>, vector<1x64x32xbf16>
    %332 = vector.shape_cast %331 : vector<1x64x32xbf16> to vector<64x32xbf16>
    %333 = arith.truncf %328 : vector<16x32xf32> to vector<16x32xbf16>
    %cst_127 = arith.constant dense<0.000000e+00> : vector<16x64xf32>
    %334 = tpu.matmul %333, %330, %cst_127 {dimension_numbers = #tpu.dot_dimension_numbers<[1], [0], [0], [1], [0, 0, 1, 1], [], []>} : vector<16x32xbf16>, vector<32x64xbf16>, vector<16x64xf32> -> vector<16x64xf32>
    %335 = vector.broadcast %195 : vector<1x64xf32> to vector<16x64xf32>
    %336 = arith.addf %334, %335 : vector<16x64xf32>
    %cst_128 = arith.constant 5.000000e-01 : f32
    %337 = vector.broadcast %cst_128 : f32 to vector<16x64xf32>
    %338 = arith.mulf %337, %336 : vector<16x64xf32>
    %cst_129 = arith.constant 4.471500e-02 : f32
    %339 = vector.broadcast %cst_129 : f32 to vector<16x64xf32>
    %340 = arith.mulf %339, %336 : vector<16x64xf32>
    %341 = arith.mulf %340, %336 : vector<16x64xf32>
    %342 = arith.mulf %341, %336 : vector<16x64xf32>
    %343 = arith.addf %336, %342 : vector<16x64xf32>
    %cst_130 = arith.constant 0.797884583 : f32
    %344 = vector.broadcast %cst_130 : f32 to vector<16x64xf32>
    %345 = arith.mulf %344, %343 : vector<16x64xf32>
    %346 = math.tanh %345 : vector<16x64xf32>
    %cst_131 = arith.constant 1.000000e+00 : f32
    %347 = vector.broadcast %cst_131 : f32 to vector<16x64xf32>
    %348 = arith.addf %347, %346 : vector<16x64xf32>
    %349 = arith.mulf %338, %348 : vector<16x64xf32>
    %350 = arith.truncf %349 : vector<16x64xf32> to vector<16x64xbf16>
    %cst_132 = arith.constant dense<0.000000e+00> : vector<16x32xf32>
    %351 = tpu.matmul %350, %332, %cst_132 {dimension_numbers = #tpu.dot_dimension_numbers<[1], [0], [0], [1], [0, 0, 1, 1], [], []>} : vector<16x64xbf16>, vector<64x32xbf16>, vector<16x32xf32> -> vector<16x32xf32>
    %352 = vector.broadcast %196 : vector<1x32xf32> to vector<16x32xf32>
    %353 = arith.addf %351, %352 : vector<16x32xf32>
    %354 = arith.addf %328, %353 : vector<16x32xf32>
    %cst_133 = arith.constant dense<0.000000e+00> : vector<16xf32>
    %355 = vector.multi_reduction <add>, %354, %cst_133 [1] : vector<16x32xf32> to vector<16xf32>
    %356 = vector.shape_cast %355 : vector<16xf32> to vector<16x1xf32>
    %cst_134 = arith.constant 3.200000e+01 : f32
    %357 = vector.broadcast %cst_134 : f32 to vector<16x1xf32>
    %358 = arith.divf %356, %357 : vector<16x1xf32>
    %359 = vector.broadcast %358 : vector<16x1xf32> to vector<16x32xf32>
    %360 = arith.subf %354, %359 : vector<16x32xf32>
    %361 = vector.broadcast %358 : vector<16x1xf32> to vector<16x32xf32>
    %362 = arith.subf %354, %361 : vector<16x32xf32>
    %363 = arith.mulf %360, %362 : vector<16x32xf32>
    %cst_135 = arith.constant dense<0.000000e+00> : vector<16xf32>
    %364 = vector.multi_reduction <add>, %363, %cst_135 [1] : vector<16x32xf32> to vector<16xf32>
    %365 = vector.shape_cast %364 : vector<16xf32> to vector<16x1xf32>
    %cst_136 = arith.constant 3.200000e+01 : f32
    %366 = vector.broadcast %cst_136 : f32 to vector<16x1xf32>
    %367 = arith.divf %365, %366 : vector<16x1xf32>
    %368 = vector.broadcast %358 : vector<16x1xf32> to vector<16x32xf32>
    %369 = arith.subf %354, %368 : vector<16x32xf32>
    %cst_137 = arith.constant 9.99999996E-13 : f32
    %370 = vector.broadcast %cst_137 : f32 to vector<16x1xf32>
    %371 = arith.addf %367, %370 : vector<16x1xf32>
    %372 = math.rsqrt %371 : vector<16x1xf32>
    %373 = vector.broadcast %372 : vector<16x1xf32> to vector<16x32xf32>
    %374 = arith.mulf %369, %373 : vector<16x32xf32>
    %375 = vector.broadcast %197 : vector<1x32xf32> to vector<16x32xf32>
    %376 = arith.mulf %374, %375 : vector<16x32xf32>
    %377 = vector.broadcast %198 : vector<1x32xf32> to vector<16x32xf32>
    %378 = arith.addf %376, %377 : vector<16x32xf32>
    %cst_138 = arith.constant dense<0.000000e+00> : vector<2x32xf32>
    %379 = tpu.matmul %2, %378, %cst_138 {dimension_numbers = #tpu.dot_dimension_numbers<[1], [0], [0], [1], [0, 0, 1, 1], [], []>} : vector<2x16xf32>, vector<16x32xf32>, vector<2x32xf32> -> vector<2x32xf32>
    %c16_139 = arith.constant 16 : index
    %c0_140 = arith.constant 0 : index
    %380 = vector.load %arg2[%c16_139, %c0_140] : memref<20x256xf32, #tpu.memory_space<vmem>>, vector<1x256xf32>
    %c17 = arith.constant 17 : index
    %c0_141 = arith.constant 0 : index
    %381 = vector.load %arg2[%c17, %c0_141] : memref<20x256xf32, #tpu.memory_space<vmem>>, vector<1x64xf32>
    %c18 = arith.constant 18 : index
    %c0_142 = arith.constant 0 : index
    %382 = vector.load %arg2[%c18, %c0_142] : memref<20x256xf32, #tpu.memory_space<vmem>>, vector<1x16xf32>
    %c19 = arith.constant 19 : index
    %c0_143 = arith.constant 0 : index
    %383 = vector.load %arg2[%c19, %c0_143] : memref<20x256xf32, #tpu.memory_space<vmem>>, vector<1x2xf32>
    %c0_144 = arith.constant 0 : index
    %c0_145 = arith.constant 0 : index
    %384 = vector.load %arg3[%c0_144, %c0_145] : memref<368x256xbf16, #tpu.memory_space<vmem>>, vector<32x256xbf16>
    %c32_146 = arith.constant 32 : index
    %c0_147 = arith.constant 0 : index
    %385 = vector.load %arg3[%c32_146, %c0_147] : memref<368x256xbf16, #tpu.memory_space<vmem>>, vector<256x64xbf16>
    %c288 = arith.constant 288 : index
    %c0_148 = arith.constant 0 : index
    %386 = vector.load %arg3[%c288, %c0_148] : memref<368x256xbf16, #tpu.memory_space<vmem>>, vector<64x16xbf16>
    %c352 = arith.constant 352 : index
    %c0_149 = arith.constant 0 : index
    %387 = vector.load %arg3[%c352, %c0_149] : memref<368x256xbf16, #tpu.memory_space<vmem>>, vector<16x2xbf16>
    %388 = arith.truncf %379 : vector<2x32xf32> to vector<2x32xbf16>
    %cst_150 = arith.constant dense<0.000000e+00> : vector<2x256xf32>
    %389 = tpu.matmul %388, %384, %cst_150 {dimension_numbers = #tpu.dot_dimension_numbers<[1], [0], [0], [1], [0, 0, 1, 1], [], []>} : vector<2x32xbf16>, vector<32x256xbf16>, vector<2x256xf32> -> vector<2x256xf32>
    %390 = vector.broadcast %380 : vector<1x256xf32> to vector<2x256xf32>
    %391 = arith.addf %389, %390 : vector<2x256xf32>
    %cst_151 = arith.constant 0.000000e+00 : f32
    %392 = vector.broadcast %cst_151 : f32 to vector<2x256xf32>
    %393 = arith.maximumf %391, %392 : vector<2x256xf32>
    %394 = arith.truncf %393 : vector<2x256xf32> to vector<2x256xbf16>
    %cst_152 = arith.constant dense<0.000000e+00> : vector<2x64xf32>
    %395 = tpu.matmul %394, %385, %cst_152 {dimension_numbers = #tpu.dot_dimension_numbers<[1], [0], [0], [1], [0, 0, 1, 1], [], []>} : vector<2x256xbf16>, vector<256x64xbf16>, vector<2x64xf32> -> vector<2x64xf32>
    %396 = vector.broadcast %381 : vector<1x64xf32> to vector<2x64xf32>
    %397 = arith.addf %395, %396 : vector<2x64xf32>
    %cst_153 = arith.constant 0.000000e+00 : f32
    %398 = vector.broadcast %cst_153 : f32 to vector<2x64xf32>
    %399 = arith.maximumf %397, %398 : vector<2x64xf32>
    %400 = arith.truncf %399 : vector<2x64xf32> to vector<2x64xbf16>
    %cst_154 = arith.constant dense<0.000000e+00> : vector<2x16xf32>
    %401 = tpu.matmul %400, %386, %cst_154 {dimension_numbers = #tpu.dot_dimension_numbers<[1], [0], [0], [1], [0, 0, 1, 1], [], []>} : vector<2x64xbf16>, vector<64x16xbf16>, vector<2x16xf32> -> vector<2x16xf32>
    %402 = vector.broadcast %382 : vector<1x16xf32> to vector<2x16xf32>
    %403 = arith.addf %401, %402 : vector<2x16xf32>
    %cst_155 = arith.constant 0.000000e+00 : f32
    %404 = vector.broadcast %cst_155 : f32 to vector<2x16xf32>
    %405 = arith.maximumf %403, %404 : vector<2x16xf32>
    %406 = arith.truncf %405 : vector<2x16xf32> to vector<2x16xbf16>
    %cst_156 = arith.constant dense<0.000000e+00> : vector<2x2xf32>
    %407 = tpu.matmul %406, %387, %cst_156 {dimension_numbers = #tpu.dot_dimension_numbers<[1], [0], [0], [1], [0, 0, 1, 1], [], []>} : vector<2x16xbf16>, vector<16x2xbf16>, vector<2x2xf32> -> vector<2x2xf32>
    %408 = vector.broadcast %383 : vector<1x2xf32> to vector<2x2xf32>
    %409 = arith.addf %407, %408 : vector<2x2xf32>
    %cst_157 = arith.constant dense<0xFF800000> : vector<2xf32>
    %410 = vector.multi_reduction <maximumf>, %409, %cst_157 [1] : vector<2x2xf32> to vector<2xf32>
    %411 = vector.shape_cast %410 : vector<2xf32> to vector<2x1xf32>
    %412 = vector.broadcast %411 : vector<2x1xf32> to vector<2x2xf32>
    %413 = arith.subf %409, %412 : vector<2x2xf32>
    %414 = math.exp %413 : vector<2x2xf32>
    %cst_158 = arith.constant dense<0.000000e+00> : vector<2xf32>
    %415 = vector.multi_reduction <add>, %414, %cst_158 [1] : vector<2x2xf32> to vector<2xf32>
    %416 = vector.shape_cast %415 : vector<2xf32> to vector<2x1xf32>
    %417 = vector.broadcast %416 : vector<2x1xf32> to vector<2x2xf32>
    %418 = arith.divf %414, %417 : vector<2x2xf32>
    %cst_159 = arith.constant 0.000000e+00 : f32
    %419 = vector.broadcast %cst_159 : f32 to vector<8x128xf32>
    %c0_160 = arith.constant 0 : index
    %c0_161 = arith.constant 0 : index
    %420 = vector.load %arg4[%c0_160, %c0_161] : memref<8x128xf32, #tpu.memory_space<vmem>>, vector<8x128xf32>
    tpu.vector_store %arg4[%c0_160, %c0_161], %419 {strides = array<i32>} : memref<8x128xf32, #tpu.memory_space<vmem>>, vector<8x128xf32>,
    %c0_162 = arith.constant 0 : index
    %c0_163 = arith.constant 0 : index
    %421 = vector.load %arg4[%c0_162, %c0_163] : memref<8x128xf32, #tpu.memory_space<vmem>>, vector<2x32xf32>
    tpu.vector_store %arg4[%c0_162, %c0_163], %379 {strides = array<i32>} : memref<8x128xf32, #tpu.memory_space<vmem>>, vector<2x32xf32>,
    %c0_164 = arith.constant 0 : index
    %c32_165 = arith.constant 32 : index
    %422 = vector.load %arg4[%c0_164, %c32_165] : memref<8x128xf32, #tpu.memory_space<vmem>>, vector<2x2xf32>
    tpu.vector_store %arg4[%c0_164, %c32_165], %418 {strides = array<i32>} : memref<8x128xf32, #tpu.memory_space<vmem>>, vector<2x2xf32>,
    return
  }
}

</mosaic_0001>

<bundles_post_ra>
// kernel: classifier_forward.1
= control target key start
LH: loop header
LB: loop body
LE: loop exit
PB: predicated region body
PF: predicated region fallthrough
CT: control target
= control target key end

     0   :  { %9 = vsyncpa [#allocation3], 0  ;;  %s3116_s15 = smov [#allocation2]   ;;  %s3667_s0 = inlined_call_operand.vmem [shape: f32[34,32], index: 0, kind: input, shape index: {}]   ;;  %s3668_s1 = inlined_call_operand.vmem [shape: bf16[2,160,96], index: 1, kind: input, shape index: {}]   ;;  %s3669_s2 = inlined_call_operand.hbm [shape: f32[20,256], index: 2, kind: input, shape index: {}]   ;;  %s3670_s3 = inlined_call_operand.vmem [shape: bf16[368,256], index: 3, kind: input, shape index: {}]   ;;  %s3671_s4 = inlined_call_operand.vmem [shape: f32[8,128], index: 4, kind: output, shape index: {}]  }
   0x1   :  { %s19_s16 = sshll.u32 %s3116_s15, 4  ;;  %s20_s16 = int_to_ptr.vmem [resolvable:$true] %s19_s16 }
   0x2   :  { %s3102_s17 = scalar_lea.vmem %s20_s16, 768  ;;  %p3107_p1 = scmp.lt.s32.totalorder %s20_s16, %s20_s16 }
   0x3   :  { %p3103_p0 = scmp.ne.s32.totalorder %s20_s16, %s3102_s17  ;;  %p3108_p2 = scmp.lt.s32.totalorder %s3102_s17, %s3102_s17 }
   0x5   :  { %p3109_p3 = por %p3108_p2, %p3107_p1 }
   0x7   :  { %p3110_p4 = pnand %p3109_p3, %p3103_p0 }
   0x9   :  { %3113 = shalt.err (!%p3110_p4)
}
   0xa   :  { %s3117_s18 = smov 256   ;;  %s3118_s19 = smov 16  }
   0xb   :  { %25 = dma.hbm_to_vmem [thread:$0]  %s3669_s2, 768, %s20_s16, [#allocation3], %s3117_s18, %s3117_s18, %s3118_s19  }
   0xc   :  { %3114 = dma.done.wait [#allocation3], 768  }
   0xd   :  { %3115 = vsyncadd [#allocation3], 4294966528  ;;  %v3119_v0 = vmov 0.0   ;;  %vm3120_vm0 = vmmov 0   ;;  %v2956_v1 = vld [vmem:[%s3668_s1 + $0x8] sm:$0xff]   ;;  %v2957_v2 = vld [vmem:[%s3668_s1] sm:$0xff]  }
   0xe   :  { %2713 = vmatprep.subr.bf16.mxu0 %v3119_v0  ;;  %2502 = vst [vmem:[%s3671_s4] sm:$0xff] %v3119_v0  ;;  %2717 = vmatprep.mubr.msk.bf16.mxu0 %vm3120_vm0, %v3119_v0  ;;  %v3181_v3 = vld [vmem:[%s3667_s0] sm:$0xff]  ;;  %v3186_v4 = vld [vmem:[%s3667_s0 + $0x8] sm:$0xff]  ;;  %vm62_vm1 = vcmask 261120   ;;  %s3121_s5 = smov 96   ;;  %vm111_vm2 = vcmask 64512   ;;  %v3208_v17 = vld [vmem:[%s3667_s0 + $0x10] sm:$0xff] }
   0xf   :  { %2721 = vmatprep.subr.bf16.mxu1 %v3119_v0  ;;  %2723 = vmatprep.mubr.msk.bf16.mxu1 %vm3120_vm0, %v3119_v0  ;;  %v49_v5 = vpack.c.bf16 %v3186_v4, %v3181_v3  ;;  %v37_v7 = vld [vmem:[#allocation2] ss:$0 sm:$0xff]  ;;  %vm163_vm3 = vcmask 130048   ;;  %v3214_v22 = vld [vmem:[%s3667_s0 + $0x18] sm:$0xff]  ;;  %s3122_s10 = smov 64   ;;  %s3123_s11 = smov 88  }
  0x10   :  { %2714 = vmatpush3.bf16.msra.mxu0 %v2956_v1  ;;  %s3124_s12 = smov 120   ;;  %v234_v49 = vld [vmem:[%s3668_s1 + $0x10] sm:$0xf]  ;;  %vm239_vm4 = vcmask 1043456   ;;  %s3125_s15 = smov 56   ;;  %vm959_vm5 = vcmask 523264  }
  0x11   :  { %2715 = vmatprep.subr.bf16.mxu0 %v3119_v0  ;;  %v241_v50 = vsel %vm239_vm4, %v234_v49, 0  ;;  %s3126_s16 = smov 80   ;;  %s3127_s17 = smov 112   ;;  %vm2503_vm6 = vcmask 254976   ;;  %vm2490_vm7 = vcmask 9216   ;;  %vm2509_vm8 = vcmask 271616  }
  0x12   :  { %s3128_s20 = smov 48   ;;  %s3129_s21 = smov 72  }
  0x13   :  { %s3130_s22 = smov 104   ;;  %s3131_s24 = smov 40  }
  0x14   :  { %2716 = vmatpush3.bf16.msra.mxu0 %v2957_v2 }
  0x15   :  { %2727 = vmatprep.subr.bf16.mxu0 %v3119_v0 }
  0x17   :  { %2718 = vmatmul.mubr.msk.bf16.vlgmr.msra.gmra.mxu0 %vm62_vm1, %v49_v5 }
  0x18   :  { %2729 = vmatprep.mubr.msk.bf16.mxu0 %vm3120_vm0, %v3119_v0 }
  0xd7   :  { %v100_v6 = vpop.f32.mrf.mxu0 }
  0xd8   :  { %v101_v10 = vadd.f32 %v100_v6, %v37_v7 }
  0xd9   :  { %v2719_v8 = vpop.f32.mrf.mxu0 }
  0xdb   :  { %v103_v9 = vpop.f32.mrf.mxu0 }
  0xdc   :  { %v104_v11 = vadd.f32 %v103_v9, %v37_v7 }
  0xdd   :  { %v2720_v12 = vpop.f32.mrf.mxu0 }
  0xde   :  { %v3195_v13 = vpack.c.bf16 %v104_v11, %v101_v10 }
  0xe0   :  { %109 = vrot.lane.b32.xlu0 %v3195_v13, %s3121_s5 }
 0x152   :  { %v110_v14 = vpop.permute.xlu0 %109 }
 0x153   :  { %v116_v15 = vsel %vm111_vm2, %v110_v14, 0 }
 0x154   :  { %2722 = vmatpush3.bf16.xpose.msra.mxu1 %v116_v15 }
 0x155   :  { %2733 = vmatprep.subr.bf16.mxu1 %v3119_v0 }
 0x15b   :  { %2724 = vmatmul.mubr.msk.bf16.vlgmr.msra.gmra.mxu1 %vm111_vm2, %v3195_v13 }
 0x15c   :  { %2735 = vmatprep.mubr.msk.bf16.mxu1 %vm3120_vm0, %v3119_v0  ;;  %2734 = vmatpush3.bf16.msra.mxu1 %v241_v50 }
 0x15d   :  { %2745 = vmatprep.subr.bf16.mxu1 %v3119_v0 }
 0x21b   :  { %v152_v16 = vpop.f32.mrf.mxu1 }
 0x21c   :  { %v159_v18 = vmul.f32 0.35355338, %v152_v16 }
 0x21d   :  { %v2725_v19 = vpop.f32.mrf.mxu1 }
 0x21e   :  { %v161_v20 = vadd.f32 %v159_v18, %v3208_v17 }
 0x21f   :  { %v155_v21 = vpop.f32.mrf.mxu1 }
 0x220   :  { %v160_v23 = vmul.f32 0.35355338, %v155_v21  ;;  %v164_v24 = vsel %vm163_vm3, %v161_v20, -inf }
 0x221   :  { %165 = vmax.xlane.f32.xlu0 %v164_v24  ;;  %v2726_v25 = vpop.f32.mrf.mxu1 }
 0x222   :  { %v162_v26 = vadd.f32 %v160_v23, %v3214_v22 }
 0x224   :  { %v167_v27 = vsel %vm163_vm3, %v162_v26, -inf }
 0x225   :  { %168 = vmax.xlane.f32.xlu1 %v167_v27 }
 0x236   :  { %187 = vrot.lane.b32.xlu1 %v3195_v13, %s3122_s10 }
 0x2aa   :  { %v166_v28 = vpop.xlane.xlu0 %165 }
 0x2ab   :  { %v170_v29 = vsub.f32 %v161_v20, %v166_v28 }
 0x2ad   :  { %v172_v30 = vmul.f32 1.442695, %v170_v29 }
 0x2ae   :  { %v169_v31 = vpop.xlane.xlu1 %168 }
 0x2af   :  { %2999 = vpow2.f32 %v172_v30  ;;  %v171_v32 = vsub.f32 %v162_v26, %v169_v31 }
 0x2b1   :  { %v174_v33 = vmul.f32 1.442695, %v171_v32 }
 0x2b2   :  { %v188_v34 = vpop.permute.xlu1 %187 }
 0x2b3   :  { %3001 = vpow2.f32 %v174_v33  ;;  %2728 = vmatpush3.bf16.msra.mxu0 %v188_v34  ;;  %v411_v33 = vld [vmem:[%s3668_s1 + $0x14] sm:$0xf] }
 0x2b4   :  { %2739 = vmatprep.subr.bf16.mxu0 %v3119_v0  ;;  %v417_v34 = vsel %vm239_vm4, %v411_v33, 0 }
 0x2bc   :  { %v3000_v35 = vpop.eup %2999 }
 0x2bd   :  { %v176_v36 = vsel %vm163_vm3, %v3000_v35, 0.0 }
 0x2be   :  { %177 = vadd.xlane.f32.xlu1 %v176_v36 }
 0x2c0   :  { %v3002_v37 = vpop.eup %3001 }
 0x2c1   :  { %v179_v38 = vsel %vm163_vm3, %v3002_v37, 0.0 }
 0x2c2   :  { %180 = vadd.xlane.f32.xlu1 %v179_v38 }
 0x2d3   :  { %288 = vrot.lane.b32.xlu1 %v3195_v13, %s3123_s11 }
 0x2d7   :  { %286 = vrot.lane.b32.xlu1 %v3195_v13, %s3124_s12 }
 0x347   :  { %v178_v39 = vpop.xlane.xlu1 %177 }
 0x348   :  { %3003 = vrcp.f32 %v178_v39 }
 0x34b   :  { %v181_v40 = vpop.xlane.xlu1 %180 }
 0x34c   :  { %3005 = vrcp.f32 %v181_v40 }
 0x34f   :  { %v289_v45 = vpop.permute.xlu1 %288 }
 0x350   :  { %v294_v47 = vsel %vm111_vm2, %v289_v45, 0 }
 0x353   :  { %v287_v48 = vpop.permute.xlu1 %286 }
 0x355   :  { %v3004_v41 = vpop.eup %3003 }
 0x356   :  { %v184_v43 = vmul.f32 %v3004_v41, %v3000_v35 }
 0x359   :  { %v3006_v42 = vpop.eup %3005 }
 0x35a   :  { %v185_v44 = vmul.f32 %v3006_v42, %v3002_v37 }
 0x35c   :  { %v186_v46 = vpack.c.bf16 %v185_v44, %v184_v43 }
 0x35e   :  { %2730 = vmatmul.mubr.msk.bf16.vlgmr.msra.gmra.mxu0 %vm163_vm3, %v186_v46 }
 0x35f   :  { %2740 = vmatpush3.bf16.xpose.msra.mxu0 %v294_v47  ;;  %2741 = vmatprep.mubr.msk.bf16.mxu0 %vm3120_vm0, %v3119_v0 }
 0x360   :  { %2751 = vmatprep.subr.bf16.mxu0 %v3119_v0 }
 0x366   :  { %2742 = vmatmul.mubr.msk.bf16.vlgmr.msra.gmra.mxu0 %vm111_vm2, %v287_v48 }
 0x367   :  { %2753 = vmatprep.mubr.msk.bf16.mxu0 %vm3120_vm0, %v3119_v0  ;;  %2752 = vmatpush3.bf16.msra.mxu0 %v417_v34 }
 0x368   :  { %2763 = vmatprep.subr.bf16.mxu0 %v3119_v0 }
 0x41e   :  { %v227_v51 = vpop.f32.mrf.mxu0 }
 0x420   :  { %v2731_v52 = vpop.f32.mrf.mxu0 }
 0x422   :  { %v230_v53 = vpop.f32.mrf.mxu0 }
 0x423   :  { %v235_v54 = vpack.c.bf16 %v230_v53, %v227_v51 }
 0x424   :  { %v2732_v55 = vpop.f32.mrf.mxu0 }
 0x425   :  { %2736 = vmatmul.mubr.msk.bf16.vlgmr.msra.gmra.mxu1 %vm111_vm2, %v235_v54 }
 0x426   :  { %v330_v56 = vpop.f32.mrf.mxu0  ;;  %2747 = vmatprep.mubr.msk.bf16.mxu1 %vm3120_vm0, %v3119_v0 }
 0x427   :  { %v337_v57 = vmul.f32 0.35355338, %v330_v56 }
 0x428   :  { %v2743_v58 = vpop.f32.mrf.mxu0 }
 0x429   :  { %v339_v59 = vadd.f32 %v337_v57, %v3208_v17 }
 0x42a   :  { %v333_v60 = vpop.f32.mrf.mxu0 }
 0x42b   :  { %v338_v61 = vmul.f32 0.35355338, %v333_v60  ;;  %v341_v62 = vsel %vm163_vm3, %v339_v59, -inf }
 0x42c   :  { %342 = vmax.xlane.f32.xlu0 %v341_v62  ;;  %v2744_v63 = vpop.f32.mrf.mxu0 }
 0x42d   :  { %v340_v1 = vadd.f32 %v338_v61, %v3214_v22  ;;  %v38_v61 = vld [vmem:[#allocation2 + $0x1] ss:$0 sm:$0xff] }
 0x42f   :  { %v344_v2 = vsel %vm163_vm3, %v340_v1, -inf }
 0x430   :  { %345 = vmax.xlane.f32.xlu1 %v344_v2 }
 0x442   :  { %364 = vrot.lane.b32.xlu0 %v3195_v13, %s3125_s15 }
 0x4b5   :  { %v343_v5 = vpop.xlane.xlu0 %342 }
 0x4b6   :  { %v347_v6 = vsub.f32 %v339_v59, %v343_v5 }
 0x4b8   :  { %v349_v7 = vmul.f32 1.442695, %v347_v6 }
 0x4b9   :  { %v365_v8 = vpop.permute.xlu0 %364  ;;  %v346_v9 = vpop.xlane.xlu1 %345 }
 0x4ba   :  { %3007 = vpow2.f32 %v349_v7  ;;  %v348_v10 = vsub.f32 %v340_v1, %v346_v9  ;;  %2746 = vmatpush3.bf16.msra.mxu1 %v365_v8 }
 0x4bb   :  { %2757 = vmatprep.subr.bf16.mxu1 %v3119_v0 }
 0x4bc   :  { %v351_v11 = vmul.f32 1.442695, %v348_v10 }
 0x4be   :  { %3009 = vpow2.f32 %v351_v11 }
 0x4c7   :  { %v3008_v12 = vpop.eup %3007 }
 0x4c8   :  { %v353_v14 = vsel %vm163_vm3, %v3008_v12, 0.0 }
 0x4c9   :  { %354 = vadd.xlane.f32.xlu0 %v353_v14 }
 0x4cb   :  { %v3010_v15 = vpop.eup %3009 }
 0x4cc   :  { %v356_v16 = vsel %vm163_vm3, %v3010_v15, 0.0 }
 0x4cd   :  { %357 = vadd.xlane.f32.xlu0 %v356_v16 }
 0x4e3   :  { %464 = vrot.lane.b32.xlu0 %v3195_v13, %s3126_s16 }
 0x4e5   :  { %v3255_v18 = vpop.f32.mrf.mxu1 }
 0x4e6   :  { %v284_v62 = vadd.f32 %v3255_v18, %v38_v61 }
 0x4e7   :  { %v2737_v19 = vpop.f32.mrf.mxu1  ;;  %462 = vrot.lane.b32.xlu0 %v3195_v13, %s3127_s17 }
 0x4e9   :  { %v3259_v20 = vpop.f32.mrf.mxu1 }
 0x4ea   :  { %v285_v5 = vadd.f32 %v3259_v20, %v38_v61 }
 0x4eb   :  { %v2738_v21 = vpop.f32.mrf.mxu1 }
 0x4ec   :  { %v587_v21 = vld [vmem:[%s3668_s1 + $0x18] sm:$0xf] }
 0x552   :  { %v355_v23 = vpop.xlane.xlu0 %354 }
 0x553   :  { %3011 = vrcp.f32 %v355_v23  ;;  %v593_v23 = vsel %vm239_vm4, %v587_v21, 0 }
 0x556   :  { %v358_v24 = vpop.xlane.xlu0 %357 }
 0x557   :  { %3013 = vrcp.f32 %v358_v24 }
 0x55a   :  { %v465_v29 = vpop.permute.xlu0 %464 }
 0x55b   :  { %v470_v31 = vsel %vm111_vm2, %v465_v29, 0 }
 0x55e   :  { %v463_v32 = vpop.permute.xlu0 %462 }
 0x560   :  { %v3012_v25 = vpop.eup %3011 }
 0x561   :  { %v361_v27 = vmul.f32 %v3012_v25, %v3008_v12 }
 0x564   :  { %v3014_v26 = vpop.eup %3013 }
 0x565   :  { %v362_v28 = vmul.f32 %v3014_v26, %v3010_v15 }
 0x567   :  { %v363_v30 = vpack.c.bf16 %v362_v28, %v361_v27 }
 0x569   :  { %2748 = vmatmul.mubr.msk.bf16.vlgmr.msra.gmra.mxu1 %vm163_vm3, %v363_v30 }
 0x56a   :  { %2758 = vmatpush3.bf16.xpose.msra.mxu1 %v470_v31  ;;  %2759 = vmatprep.mubr.msk.bf16.mxu1 %vm3120_vm0, %v3119_v0 }
 0x56b   :  { %2769 = vmatprep.subr.bf16.mxu1 %v3119_v0 }
 0x571   :  { %2760 = vmatmul.mubr.msk.bf16.vlgmr.msra.gmra.mxu1 %vm111_vm2, %v463_v32 }
 0x572   :  { %2771 = vmatprep.mubr.msk.bf16.mxu1 %vm3120_vm0, %v3119_v0  ;;  %2770 = vmatpush3.bf16.msra.mxu1 %v593_v23 }
 0x573   :  { %2781 = vmatprep.subr.bf16.mxu1 %v3119_v0 }
 0x629   :  { %v404_v35 = vpop.f32.mrf.mxu1 }
 0x62b   :  { %v2749_v36 = vpop.f32.mrf.mxu1 }
 0x62d   :  { %v407_v37 = vpop.f32.mrf.mxu1 }
 0x62e   :  { %v412_v38 = vpack.c.bf16 %v407_v37, %v404_v35 }
 0x62f   :  { %v2750_v39 = vpop.f32.mrf.mxu1 }
 0x630   :  { %2754 = vmatmul.mubr.msk.bf16.vlgmr.msra.gmra.mxu0 %vm111_vm2, %v412_v38 }
 0x631   :  { %v506_v40 = vpop.f32.mrf.mxu1  ;;  %2765 = vmatprep.mubr.msk.bf16.mxu0 %vm3120_vm0, %v3119_v0 }
 0x632   :  { %v513_v41 = vmul.f32 0.35355338, %v506_v40 }
 0x633   :  { %v2761_v42 = vpop.f32.mrf.mxu1 }
 0x634   :  { %v515_v43 = vadd.f32 %v513_v41, %v3208_v17 }
 0x635   :  { %v509_v44 = vpop.f32.mrf.mxu1 }
 0x636   :  { %v514_v45 = vmul.f32 0.35355338, %v509_v44  ;;  %v517_v46 = vsel %vm163_vm3, %v515_v43, -inf }
 0x637   :  { %518 = vmax.xlane.f32.xlu1 %v517_v46  ;;  %v2762_v47 = vpop.f32.mrf.mxu1 }
 0x638   :  { %v516_v48 = vadd.f32 %v514_v45, %v3214_v22 }
 0x63a   :  { %v520_v49 = vsel %vm163_vm3, %v516_v48, -inf }
 0x63b   :  { %521 = vmax.xlane.f32.xlu0 %v520_v49 }
 0x648   :  { %540 = vrot.lane.b32.xlu1 %v3195_v13, %s3128_s20 }
 0x6c0   :  { %v519_v50 = vpop.xlane.xlu1 %518 }
 0x6c1   :  { %v523_v51 = vsub.f32 %v515_v43, %v519_v50 }
 0x6c3   :  { %v525_v52 = vmul.f32 1.442695, %v523_v51 }
 0x6c4   :  { %v541_v53 = vpop.permute.xlu1 %540  ;;  %v522_v54 = vpop.xlane.xlu0 %521 }
 0x6c5   :  { %3015 = vpow2.f32 %v525_v52  ;;  %v524_v55 = vsub.f32 %v516_v48, %v522_v54  ;;  %2764 = vmatpush3.bf16.msra.mxu0 %v541_v53 }
 0x6c6   :  { %2775 = vmatprep.subr.bf16.mxu0 %v3119_v0 }
 0x6c7   :  { %v527_v56 = vmul.f32 1.442695, %v524_v55 }
 0x6c9   :  { %3017 = vpow2.f32 %v527_v56 }
 0x6d2   :  { %v3016_v57 = vpop.eup %3015 }
 0x6d3   :  { %v529_v58 = vsel %vm163_vm3, %v3016_v57, 0.0 }
 0x6d4   :  { %530 = vadd.xlane.f32.xlu1 %v529_v58 }
 0x6d6   :  { %v3018_v59 = vpop.eup %3017 }
 0x6d7   :  { %v532_v60 = vsel %vm163_vm3, %v3018_v59, 0.0 }
 0x6d8   :  { %533 = vadd.xlane.f32.xlu1 %v532_v60 }
 0x6e9   :  { %640 = vrot.lane.b32.xlu1 %v3195_v13, %s3129_s21 }
 0x6ed   :  { %638 = vrot.lane.b32.xlu1 %v3195_v13, %s3130_s22 }
 0x6f0   :  { %v453_v63 = vpop.f32.mrf.mxu0 }
 0x6f1   :  { %v3291_v1 = vadd.f32 %v453_v63, %v284_v62  ;;  %v763_v62 = vld [vmem:[%s3668_s1 + $0x1c] sm:$0xf] }
 0x6f2   :  { %v2755_v2 = vpop.f32.mrf.mxu0  ;;  %v769_v63 = vsel %vm239_vm4, %v763_v62, 0 }
 0x6f4   :  { %v456_v6 = vpop.f32.mrf.mxu0 }
 0x6f5   :  { %v3294_v7 = vadd.f32 %v456_v6, %v285_v5 }
 0x6f6   :  { %v2756_v8 = vpop.f32.mrf.mxu0 }
 0x75d   :  { %v531_v9 = vpop.xlane.xlu1 %530 }
 0x75e   :  { %3019 = vrcp.f32 %v531_v9 }
 0x761   :  { %v534_v10 = vpop.xlane.xlu1 %533 }
 0x762   :  { %3021 = vrcp.f32 %v534_v10 }
 0x765   :  { %v641_v16 = vpop.permute.xlu1 %640 }
 0x766   :  { %v646_v19 = vsel %vm111_vm2, %v641_v16, 0 }
 0x769   :  { %v639_v20 = vpop.permute.xlu1 %638 }
 0x76b   :  { %v3020_v11 = vpop.eup %3019 }
 0x76c   :  { %v537_v14 = vmul.f32 %v3020_v11, %v3016_v57 }
 0x76f   :  { %v3022_v12 = vpop.eup %3021 }
 0x770   :  { %v538_v15 = vmul.f32 %v3022_v12, %v3018_v59 }
 0x772   :  { %v539_v18 = vpack.c.bf16 %v538_v15, %v537_v14 }
 0x774   :  { %2766 = vmatmul.mubr.msk.bf16.vlgmr.msra.gmra.mxu0 %vm163_vm3, %v539_v18 }
 0x775   :  { %2776 = vmatpush3.bf16.xpose.msra.mxu0 %v646_v19  ;;  %2777 = vmatprep.mubr.msk.bf16.mxu0 %vm3120_vm0, %v3119_v0 }
 0x776   :  { %2787 = vmatprep.subr.bf16.mxu0 %v3119_v0 }
 0x77c   :  { %2778 = vmatmul.mubr.msk.bf16.vlgmr.msra.gmra.mxu0 %vm111_vm2, %v639_v20 }
 0x77d   :  { %2789 = vmatprep.mubr.msk.bf16.mxu0 %vm3120_vm0, %v3119_v0  ;;  %2788 = vmatpush3.bf16.msra.mxu0 %v769_v63 }
 0x77e   :  { %2801 = vmatprep.subr.bf16.mxu0 %v3119_v0 }
 0x834   :  { %v580_v24 = vpop.f32.mrf.mxu0 }
 0x836   :  { %v2767_v25 = vpop.f32.mrf.mxu0 }
 0x838   :  { %v583_v26 = vpop.f32.mrf.mxu0 }
 0x839   :  { %v588_v27 = vpack.c.bf16 %v583_v26, %v580_v24 }
 0x83a   :  { %v2768_v28 = vpop.f32.mrf.mxu0 }
 0x83b   :  { %2772 = vmatmul.mubr.msk.bf16.vlgmr.msra.gmra.mxu1 %vm111_vm2, %v588_v27 }
 0x83c   :  { %v682_v29 = vpop.f32.mrf.mxu0  ;;  %2783 = vmatprep.mubr.msk.bf16.mxu1 %vm3120_vm0, %v3119_v0 }
 0x83d   :  { %v689_v30 = vmul.f32 0.35355338, %v682_v29 }
 0x83e   :  { %v2779_v31 = vpop.f32.mrf.mxu0 }
 0x83f   :  { %v691_v32 = vadd.f32 %v689_v30, %v3208_v17  ;;  %v2959_v30 = vld [vmem:[%s3668_s1 + $0x20] sm:$0xff]  }
 0x840   :  { %v685_v33 = vpop.f32.mrf.mxu0 }
 0x841   :  { %v690_v34 = vmul.f32 0.35355338, %v685_v33  ;;  %v693_v35 = vsel %vm163_vm3, %v691_v32, -inf }
 0x842   :  { %694 = vmax.xlane.f32.xlu0 %v693_v35  ;;  %v2780_v36 = vpop.f32.mrf.mxu0 }
 0x843   :  { %v692_v37 = vadd.f32 %v690_v34, %v3214_v22 }
 0x845   :  { %v696_v38 = vsel %vm163_vm3, %v692_v37, -inf }
 0x846   :  { %697 = vmax.xlane.f32.xlu1 %v696_v38 }
 0x8cb   :  { %v695_v39 = vpop.xlane.xlu0 %694 }
 0x8cc   :  { %v699_v40 = vsub.f32 %v691_v32, %v695_v39  ;;  %v39_v39 = vld [vmem:[#allocation2 + $0x2] ss:$0 sm:$0xff] }
 0x8ce   :  { %v701_v41 = vmul.f32 1.442695, %v699_v40 }
 0x8cf   :  { %v698_v42 = vpop.xlane.xlu1 %697 }
 0x8d0   :  { %3023 = vpow2.f32 %v701_v41  ;;  %v700_v43 = vsub.f32 %v692_v37, %v698_v42 }
 0x8d2   :  { %v703_v44 = vmul.f32 1.442695, %v700_v43  ;;  %v40_v43 = vld [vmem:[#allocation2 + $0x3] ss:$0 sm:$0xff] }
 0x8d4   :  { %3025 = vpow2.f32 %v703_v44 }
 0x8dd   :  { %v3024_v45 = vpop.eup %3023 }
 0x8de   :  { %v705_v46 = vsel %vm163_vm3, %v3024_v45, 0.0 }
 0x8df   :  { %706 = vadd.xlane.f32.xlu0 %v705_v46 }
 0x8e1   :  { %v3026_v47 = vpop.eup %3025 }
 0x8e2   :  { %v708_v48 = vsel %vm163_vm3, %v3026_v47, 0.0 }
 0x8e3   :  { %709 = vadd.xlane.f32.xlu0 %v708_v48  ;;  %v2960_v48 = vld [vmem:[%s3668_s1 + $0x48] sm:$0xff]  }
 0x8f9   :  { %716 = vrot.lane.b32.xlu0 %v3195_v13, %s3131_s24 }
 0x8fb   :  { %v629_v49 = vpop.f32.mrf.mxu1 }
 0x8fc   :  { %v636_v50 = vadd.f32 %v629_v49, %v3291_v1  ;;  %v2961_v49 = vld [vmem:[%s3668_s1 + $0x40] sm:$0xff]  }
 0x8fd   :  { %v2773_v51 = vpop.f32.mrf.mxu1 }
 0x8fe   :  { %v2963_v51 = vld [vmem:[%s3668_s1 + $0x30] sm:$0xff]  }
 0x8ff   :  { %v632_v52 = vpop.f32.mrf.mxu1 }
 0x900   :  { %v637_v53 = vadd.f32 %v632_v52, %v3294_v7  ;;  %v41_v52 = vld [vmem:[#allocation2 + $0x4] ss:$0 sm:$0xff] }
 0x901   :  { %v2774_v54 = vpop.f32.mrf.mxu1 }
 0x968   :  { %v707_v55 = vpop.xlane.xlu0 %706 }
 0x969   :  { %3027 = vrcp.f32 %v707_v55 }
 0x96c   :  { %v710_v56 = vpop.xlane.xlu0 %709 }
 0x96d   :  { %3029 = vrcp.f32 %v710_v56 }
 0x970   :  { %v717_v57 = vpop.permute.xlu0 %716 }
 0x971   :  { %2782 = vmatpush3.bf16.msra.mxu1 %v717_v57 }
 0x972   :  { %2793 = vmatprep.subr.bf16.mxu1 %v3119_v0 }
 0x976   :  { %v3028_v58 = vpop.eup %3027 }
 0x977   :  { %v713_v60 = vmul.f32 %v3028_v58, %v3024_v45 }
 0x97a   :  { %v3030_v59 = vpop.eup %3029 }
 0x97b   :  { %v714_v13 = vmul.f32 %v3030_v59, %v3026_v47 }
 0x97d   :  { %v715_v61 = vpack.c.bf16 %v714_v13, %v713_v60 }
 0x97f   :  { %2784 = vmatmul.mubr.msk.bf16.vlgmr.msra.gmra.mxu1 %vm163_vm3, %v715_v61 }
 0x980   :  { %2797 = vmatprep.mubr.msk.bf16.mxu1 %vm3120_vm0, %v3119_v0 }
 0xa3f   :  { %v756_v1 = vpop.f32.mrf.mxu1 }
 0xa41   :  { %v2785_v2 = vpop.f32.mrf.mxu1 }
 0xa43   :  { %v759_v5 = vpop.f32.mrf.mxu1 }
 0xa44   :  { %v764_v6 = vpack.c.bf16 %v759_v5, %v756_v1 }
 0xa45   :  { %v2786_v7 = vpop.f32.mrf.mxu1 }
 0xa46   :  { %2790 = vmatmul.mubr.msk.bf16.vlgmr.msra.gmra.mxu0 %vm111_vm2, %v764_v6 }
 0xa47   :  { %2809 = vmatprep.mubr.msk.bf16.mxu0 %vm3120_vm0, %v3119_v0  ;;  %2802 = vmatpush3.bf16.msra.mxu0 %v2960_v48  ;;  %v43_v48 = vld [vmem:[#allocation2 + $0x6] ss:$0 sm:$0xff] }
 0xa48   :  { %2803 = vmatprep.subr.bf16.mxu0 %v3119_v0 }
 0xa4b   :  { %2804 = vmatpush3.bf16.msra.mxu0 %v2961_v49 }
 0xa4c   :  { %2805 = vmatprep.subr.bf16.mxu0 %v3119_v0 }
 0xb06   :  { %v805_v8 = vpop.f32.mrf.mxu0 }
 0xb07   :  { %v812_v9 = vadd.f32 %v805_v8, %v636_v50  ;;  %v2962_v50 = vld [vmem:[%s3668_s1 + $0x38] sm:$0xff]  }
 0xb08   :  { %v2791_v10 = vpop.f32.mrf.mxu0  ;;  %2806 = vmatpush3.bf16.msra.mxu0 %v2962_v50 }
 0xb09   :  { %v814_v11 = vadd.f32 %v812_v9, %v3181_v3  ;;  %2807 = vmatprep.subr.bf16.mxu0 %v3119_v0 }
 0xb0a   :  { %v808_v12 = vpop.f32.mrf.mxu0 }
 0xb0b   :  { %v813_v14 = vadd.f32 %v808_v12, %v637_v53  ;;  %v816_v15 = vsel %vm62_vm1, %v814_v11, 0.0 }
 0xb0c   :  { %817 = vadd.xlane.f32.xlu0 %v816_v15  ;;  %v2792_v16 = vpop.f32.mrf.mxu0  ;;  %2808 = vmatpush3.bf16.msra.mxu0 %v2963_v51 }
 0xb0d   :  { %v815_v18 = vadd.f32 %v813_v14, %v3186_v4  ;;  %v2958_v4 = vld [vmem:[%s3668_s1 + $0x28] sm:$0xff]   ;;  %2827 = vmatprep.subr.bf16.mxu0 %v3119_v0 }
 0xb0e   :  { %2794 = vmatpush3.bf16.msra.mxu1 %v2958_v4 }
 0xb0f   :  { %v819_v19 = vsel %vm62_vm1, %v815_v18, 0.0  ;;  %2795 = vmatprep.subr.bf16.mxu1 %v3119_v0 }
 0xb10   :  { %820 = vadd.xlane.f32.xlu1 %v819_v19 }
 0xb12   :  { %2796 = vmatpush3.bf16.msra.mxu1 %v2959_v30 }
 0xb13   :  { %2813 = vmatprep.subr.bf16.mxu1 %v3119_v0 }
 0xb95   :  { %v818_v20 = vpop.xlane.xlu0 %817 }
 0xb96   :  { %v823_v21 = vmul.f32 0.03125, %v818_v20 }
 0xb98   :  { %v825_v23 = vsub.f32 %v814_v11, %v823_v21 }
 0xb99   :  { %v821_v24 = vpop.xlane.xlu1 %820 }
 0xb9a   :  { %v824_v25 = vmul.f32 0.03125, %v821_v24  ;;  %v827_v26 = vmul.f32 %v825_v23, %v825_v23 }
 0xb9c   :  { %v826_v27 = vsub.f32 %v815_v18, %v824_v25  ;;  %v829_v3 = vsel %vm62_vm1, %v827_v26, 0.0  ;;  %v42_v18 = vld [vmem:[#allocation2 + $0x5] ss:$0 sm:$0xff] }
 0xb9d   :  { %830 = vadd.xlane.f32.xlu1 %v829_v3 }
 0xb9e   :  { %v828_v28 = vmul.f32 %v826_v27, %v826_v27 }
 0xba0   :  { %v832_v29 = vsel %vm62_vm1, %v828_v28, 0.0 }
 0xba1   :  { %833 = vadd.xlane.f32.xlu1 %v832_v29 }
 0xc26   :  { %v831_v31 = vpop.xlane.xlu1 %830 }
 0xc27   :  { %v835_v32 = vmul.f32 0.03125, %v831_v31 }
 0xc29   :  { %v837_v33 = vadd.f32 1e-12, %v835_v32 }
 0xc2a   :  { %v834_v34 = vpop.xlane.xlu1 %833 }
 0xc2b   :  { %3031 = vrsqrt.f32 %v837_v33  ;;  %v836_v35 = vmul.f32 0.03125, %v834_v34 }
 0xc2d   :  { %v838_v36 = vadd.f32 1e-12, %v836_v35 }
 0xc2f   :  { %3033 = vrsqrt.f32 %v838_v36 }
 0xc38   :  { %v3032_v37 = vpop.eup %3031 }
 0xc39   :  { %v841_v38 = vmul.f32 %v3032_v37, %v825_v23 }
 0xc3b   :  { %v843_v42 = vmul.f32 %v841_v38, %v39_v39  ;;  %v2964_v38 = vld [vmem:[%s3668_s1 + $0x58] sm:$0xff]  }
 0xc3c   :  { %v3034_v40 = vpop.eup %3033 }
 0xc3d   :  { %v842_v41 = vmul.f32 %v3034_v40, %v826_v27  ;;  %v845_v45 = vadd.f32 %v843_v42, %v40_v43 }
 0xc3f   :  { %v844_v44 = vmul.f32 %v842_v41, %v39_v39  ;;  %v2965_v39 = vld [vmem:[%s3668_s1 + $0x50] sm:$0xff]  }
 0xc41   :  { %v846_v46 = vadd.f32 %v844_v44, %v40_v43 }
 0xc43   :  { %v859_v47 = vpack.c.bf16 %v846_v46, %v845_v45 }
 0xc45   :  { %2798 = vmatmul.mubr.msk.bf16.vlgmr.msra.gmra.mxu1 %vm62_vm1, %v859_v47 }
 0xc46   :  { %2817 = vmatprep.mubr.msk.bf16.mxu1 %vm3120_vm0, %v3119_v0  ;;  %2814 = vmatpush3.bf16.msra.mxu1 %v2964_v38 }
 0xc47   :  { %2815 = vmatprep.subr.bf16.mxu1 %v3119_v0 }
 0xc4a   :  { %2816 = vmatpush3.bf16.msra.mxu1 %v2965_v39 }
 0xc4b   :  { %2821 = vmatprep.subr.bf16.mxu1 %v3119_v0 }
 0xd05   :  { %v909_v53 = vpop.f32.mrf.mxu1 }
 0xd06   :  { %v910_v54 = vadd.f32 %v909_v53, %v41_v52 }
 0xd07   :  { %v2799_v55 = vpop.f32.mrf.mxu1 }
 0xd08   :  { %v918_v56 = vmul.f32 0.044715, %v910_v54  ;;  %v916_v10 = vmul.f32 0.5, %v910_v54 }
 0xd09   :  { %v912_v57 = vpop.f32.mrf.mxu1 }
 0xd0a   :  { %v920_v58 = vmul.f32 %v918_v56, %v910_v54  ;;  %v913_v59 = vadd.f32 %v912_v57, %v41_v52  ;;  %v44_v52 = vld [vmem:[#allocation2 + $0x7] ss:$0 sm:$0xff] }
 0xd0b   :  { %v2800_v60 = vpop.f32.mrf.mxu1  ;;  %v3392_v56 = vld [vmem:[%s3671_s4] sm:$0xff] }
 0xd0c   :  { %v922_v13 = vmul.f32 %v920_v58, %v910_v54  ;;  %v919_v61 = vmul.f32 0.044715, %v913_v59  ;;  %v917_v11 = vmul.f32 0.5, %v913_v59  ;;  %v1036_v58 = vld [vmem:[#allocation2 + $0x10] ss:$0 sm:$0xff] }
 0xd0e   :  { %v924_v62 = vadd.f32 %v922_v13, %v910_v54  ;;  %v921_v63 = vmul.f32 %v919_v61, %v913_v59 }
 0xd10   :  { %v926_v1 = vmul.f32 0.7978846, %v924_v62  ;;  %v923_v2 = vmul.f32 %v921_v63, %v913_v59 }
 0xd12   :  { %3035 = vtanh.f32 %v926_v1  ;;  %v925_v5 = vadd.f32 %v923_v2, %v913_v59 }
 0xd14   :  { %v927_v6 = vmul.f32 0.7978846, %v925_v5 }
 0xd16   :  { %3037 = vtanh.f32 %v927_v6 }
 0xd1f   :  { %v3036_v7 = vpop.eup %3035 }
 0xd20   :  { %v930_v8 = vadd.f32 1.0, %v3036_v7 }
 0xd22   :  { %v932_v14 = vmul.f32 %v930_v8, %v916_v10 }
 0xd23   :  { %v3038_v9 = vpop.eup %3037 }
 0xd24   :  { %v931_v12 = vadd.f32 1.0, %v3038_v9 }
 0xd26   :  { %v933_v15 = vmul.f32 %v931_v12, %v917_v11 }
 0xd28   :  { %v934_v16 = vpack.c.bf16 %v933_v15, %v932_v14 }
 0xd2a   :  { %2810 = vmatmul.mubr.msk.bf16.vlgmr.msra.gmra.mxu0 %vm959_vm5, %v934_v16 }
 0xd2b   :  { %2829 = vmatprep.mubr.msk.bf16.mxu0 %vm3120_vm0, %v3119_v0 }
 0xdea   :  { %v997_v19 = vpop.f32.mrf.mxu0 }
 0xdeb   :  { %v998_v20 = vadd.f32 %v997_v19, %v42_v18 }
 0xdec   :  { %v2811_v21 = vpop.f32.mrf.mxu0 }
 0xded   :  { %v1004_v23 = vadd.f32 %v998_v20, %v845_v45 }
 0xdee   :  { %v1000_v24 = vpop.f32.mrf.mxu0 }
 0xdef   :  { %v1001_v25 = vadd.f32 %v1000_v24, %v42_v18  ;;  %v1006_v26 = vsel %vm62_vm1, %v1004_v23, 0.0 }
 0xdf0   :  { %1007 = vadd.xlane.f32.xlu1 %v1006_v26  ;;  %v2812_v27 = vpop.f32.mrf.mxu0 }
 0xdf1   :  { %v1005_v3 = vadd.f32 %v1001_v25, %v846_v46 }
 0xdf3   :  { %v1009_v28 = vsel %vm62_vm1, %v1005_v3, 0.0 }
 0xdf4   :  { %1010 = vadd.xlane.f32.xlu1 %v1009_v28 }
 0xe79   :  { %v1008_v29 = vpop.xlane.xlu1 %1007 }
 0xe7a   :  { %v1012_v4 = vmul.f32 0.03125, %v1008_v29 }
 0xe7c   :  { %v1014_v30 = vsub.f32 %v1004_v23, %v1012_v4 }
 0xe7d   :  { %v1011_v31 = vpop.xlane.xlu1 %1010 }
 0xe7e   :  { %v1013_v32 = vmul.f32 0.03125, %v1011_v31  ;;  %v1016_v33 = vmul.f32 %v1014_v30, %v1014_v30 }
 0xe80   :  { %v1015_v34 = vsub.f32 %v1005_v3, %v1013_v32  ;;  %v1018_v35 = vsel %vm62_vm1, %v1016_v33, 0.0 }
 0xe81   :  { %1019 = vadd.xlane.f32.xlu1 %v1018_v35 }
 0xe82   :  { %v1017_v36 = vmul.f32 %v1015_v34, %v1015_v34 }
 0xe84   :  { %v1021_v37 = vsel %vm62_vm1, %v1017_v36, 0.0 }
 0xe85   :  { %1022 = vadd.xlane.f32.xlu1 %v1021_v37  ;;  %v2548_v37 = vld [vmem:[%s3668_s1 + $0x60] sm:$0xf] }
 0xe86   :  { %v1237_v38 = vsel %vm239_vm4, %v2548_v37, 0 }
 0xf0a   :  { %v1020_v40 = vpop.xlane.xlu1 %1019 }
 0xf0b   :  { %v1024_v41 = vmul.f32 0.03125, %v1020_v40 }
 0xf0d   :  { %v1026_v42 = vadd.f32 1e-12, %v1024_v41 }
 0xf0e   :  { %v1023_v43 = vpop.xlane.xlu1 %1022 }
 0xf0f   :  { %3039 = vrsqrt.f32 %v1026_v42  ;;  %v1025_v44 = vmul.f32 0.03125, %v1023_v43 }
 0xf11   :  { %v1027_v45 = vadd.f32 1e-12, %v1025_v44 }
 0xf13   :  { %3041 = vrsqrt.f32 %v1027_v45 }
 0xf1c   :  { %v3040_v46 = vpop.eup %3039 }
 0xf1d   :  { %v1030_v47 = vmul.f32 %v3040_v46, %v1014_v30 }
 0xf1f   :  { %v1032_v51 = vmul.f32 %v1030_v47, %v43_v48 }
 0xf20   :  { %v3042_v49 = vpop.eup %3041 }
 0xf21   :  { %v1031_v50 = vmul.f32 %v3042_v49, %v1015_v34  ;;  %v3382_v54 = vadd.f32 %v1032_v51, %v44_v52 }
 0xf23   :  { %v1033_v53 = vmul.f32 %v1031_v50, %v43_v48 }
 0xf25   :  { %v3384_v55 = vadd.f32 %v1033_v53, %v44_v52 }
 0xf27   :  { %v1049_v0 = vpack.c.bf16 %v3384_v55, %v3382_v54 }
 0xf29   :  { %2818 = vmatmul.mubr.msk.bf16.vlgmr.msra.gmra.mxu1 %vm62_vm1, %v1049_v0 }
 0xf2a   :  { %2823 = vmatprep.mubr.msk.bf16.mxu1 %vm3120_vm0, %v3392_v56 }
 0xfe9   :  { %v1099_v57 = vpop.f32.mrf.mxu1 }
 0xfea   :  { %v1100_v13 = vadd.f32 %v1099_v57, %v1036_v58 }
 0xfeb   :  { %v2819_v59 = vpop.f32.mrf.mxu1 }
 0xfed   :  { %v1102_v60 = vpop.f32.mrf.mxu1 }
 0xfee   :  { %v1103_v61 = vadd.f32 %v1102_v60, %v1036_v58 }
 0xfef   :  { %v2820_v62 = vpop.f32.mrf.mxu1 }
 0xff0   :  { %v3396_v63 = vpack.c.bf16 %v1103_v61, %v1100_v13 }
 0xff2   :  { %1108 = vrot.lane.b32.xlu0 %v3396_v63, %s3121_s5 }
 0xff6   :  { %1284 = vrot.lane.b32.xlu0 %v3396_v63, %s3123_s11 }
 0xffa   :  { %1282 = vrot.lane.b32.xlu0 %v3396_v63, %s3124_s12 }
0x1064   :  { %v1109_v1 = vpop.permute.xlu0 %1108 }
0x1065   :  { %v1114_v2 = vsel %vm111_vm2, %v1109_v1, 0 }
0x1066   :  { %2822 = vmatpush3.bf16.xpose.msra.mxu1 %v1114_v2 }
0x1067   :  { %2833 = vmatprep.subr.bf16.mxu1 %v3392_v56 }
0x1068   :  { %v1285_v33 = vpop.permute.xlu0 %1284 }
0x1069   :  { %v1290_v35 = vsel %vm111_vm2, %v1285_v33, 0 }
0x106c   :  { %v1283_v36 = vpop.permute.xlu0 %1282 }
0x106d   :  { %2824 = vmatmul.mubr.msk.bf16.vlgmr.msra.gmra.mxu1 %vm111_vm2, %v3396_v63 }
0x106e   :  { %2835 = vmatprep.mubr.msk.bf16.mxu1 %vm3120_vm0, %v3392_v56  ;;  %2834 = vmatpush3.bf16.msra.mxu1 %v1237_v38 }
0x106f   :  { %2845 = vmatprep.subr.bf16.mxu1 %v3392_v56 }
0x112d   :  { %v1150_v5 = vpop.f32.mrf.mxu1 }
0x112e   :  { %v1157_v6 = vmul.f32 0.35355338, %v1150_v5 }
0x112f   :  { %v2825_v7 = vpop.f32.mrf.mxu1 }
0x1130   :  { %v1159_v8 = vadd.f32 %v1157_v6, %v3208_v17 }
0x1131   :  { %v1153_v9 = vpop.f32.mrf.mxu1 }
0x1132   :  { %v1158_v10 = vmul.f32 0.35355338, %v1153_v9  ;;  %v1161_v11 = vsel %vm163_vm3, %v1159_v8, -inf }
0x1133   :  { %1162 = vmax.xlane.f32.xlu1 %v1161_v11  ;;  %v2826_v12 = vpop.f32.mrf.mxu1 }
0x1134   :  { %v1160_v14 = vadd.f32 %v1158_v10, %v3214_v22 }
0x1136   :  { %v1164_v15 = vsel %vm163_vm3, %v1160_v14, -inf }
0x1137   :  { %1165 = vmax.xlane.f32.xlu1 %v1164_v15 }
0x11bc   :  { %v1163_v16 = vpop.xlane.xlu1 %1162 }
0x11bd   :  { %v1167_v18 = vsub.f32 %v1159_v8, %v1163_v16 }
0x11bf   :  { %v1169_v19 = vmul.f32 1.442695, %v1167_v18 }
0x11c0   :  { %v1166_v20 = vpop.xlane.xlu1 %1165 }
0x11c1   :  { %3043 = vpow2.f32 %v1169_v19  ;;  %v1168_v21 = vsub.f32 %v1160_v14, %v1166_v20  ;;  %v2552_v20 = vld [vmem:[%s3668_s1 + $0x64] sm:$0xf] }
0x11c3   :  { %v1171_v23 = vmul.f32 1.442695, %v1168_v21  ;;  %v1413_v21 = vsel %vm239_vm4, %v2552_v20, 0 }
0x11c5   :  { %3045 = vpow2.f32 %v1171_v23 }
0x11ce   :  { %v3044_v24 = vpop.eup %3043 }
0x11cf   :  { %v1173_v25 = vsel %vm163_vm3, %v3044_v24, 0.0 }
0x11d0   :  { %1174 = vadd.xlane.f32.xlu1 %v1173_v25 }
0x11d2   :  { %v3046_v26 = vpop.eup %3045 }
0x11d3   :  { %v1176_v27 = vsel %vm163_vm3, %v3046_v26, 0.0 }
0x11d4   :  { %1177 = vadd.xlane.f32.xlu1 %v1176_v27 }
0x11e5   :  { %1184 = vrot.lane.b32.xlu1 %v3396_v63, %s3122_s10 }
0x1259   :  { %v1175_v3 = vpop.xlane.xlu1 %1174 }
0x125a   :  { %3047 = vrcp.f32 %v1175_v3 }
0x125d   :  { %v1178_v28 = vpop.xlane.xlu1 %1177 }
0x125e   :  { %3049 = vrcp.f32 %v1178_v28 }
0x1261   :  { %v1185_v29 = vpop.permute.xlu1 %1184 }
0x1262   :  { %2828 = vmatpush3.bf16.msra.mxu0 %v1185_v29 }
0x1263   :  { %2839 = vmatprep.subr.bf16.mxu0 %v3392_v56 }
0x1267   :  { %v3048_v4 = vpop.eup %3047 }
0x1268   :  { %v1181_v31 = vmul.f32 %v3048_v4, %v3044_v24  ;;  %v3471_v4 = vld [vmem:[%s3667_s0 + $0x10] sm:$0xff] }
0x126b   :  { %v3050_v30 = vpop.eup %3049 }
0x126c   :  { %v1182_v32 = vmul.f32 %v3050_v30, %v3046_v26 }
0x126e   :  { %v1183_v34 = vpack.c.bf16 %v1182_v32, %v1181_v31 }
0x1270   :  { %2830 = vmatmul.mubr.msk.bf16.vlgmr.msra.gmra.mxu0 %vm163_vm3, %v1183_v34 }
0x1271   :  { %2840 = vmatpush3.bf16.xpose.msra.mxu0 %v1290_v35  ;;  %2841 = vmatprep.mubr.msk.bf16.mxu0 %vm3120_vm0, %v3392_v56  ;;  %v3478_v35 = vld [vmem:[%s3667_s0 + $0x18] sm:$0xff] }
0x1272   :  { %2851 = vmatprep.subr.bf16.mxu0 %v3392_v56 }
0x1278   :  { %2842 = vmatmul.mubr.msk.bf16.vlgmr.msra.gmra.mxu0 %vm111_vm2, %v1283_v36 }
0x1279   :  { %2853 = vmatprep.mubr.msk.bf16.mxu0 %vm3120_vm0, %v3392_v56  ;;  %2852 = vmatpush3.bf16.msra.mxu0 %v1413_v21 }
0x127a   :  { %2863 = vmatprep.subr.bf16.mxu0 %v3392_v56 }
0x1330   :  { %v1224_v39 = vpop.f32.mrf.mxu0 }
0x1332   :  { %v2831_v40 = vpop.f32.mrf.mxu0 }
0x1334   :  { %v1227_v41 = vpop.f32.mrf.mxu0 }
0x1335   :  { %v1232_v42 = vpack.c.bf16 %v1227_v41, %v1224_v39 }
0x1336   :  { %v2832_v43 = vpop.f32.mrf.mxu0 }
0x1337   :  { %2836 = vmatmul.mubr.msk.bf16.vlgmr.msra.gmra.mxu1 %vm111_vm2, %v1232_v42 }
0x1338   :  { %v1326_v44 = vpop.f32.mrf.mxu0  ;;  %2847 = vmatprep.mubr.msk.bf16.mxu1 %vm3120_vm0, %v3392_v56 }
0x1339   :  { %v1333_v45 = vmul.f32 0.35355338, %v1326_v44 }
0x133a   :  { %v2843_v46 = vpop.f32.mrf.mxu0 }
0x133b   :  { %v1335_v47 = vadd.f32 %v1333_v45, %v3208_v17 }
0x133c   :  { %v1329_v48 = vpop.f32.mrf.mxu0 }
0x133d   :  { %v1334_v49 = vmul.f32 0.35355338, %v1329_v48  ;;  %v1337_v50 = vsel %vm163_vm3, %v1335_v47, -inf }
0x133e   :  { %1338 = vmax.xlane.f32.xlu0 %v1337_v50  ;;  %v2844_v51 = vpop.f32.mrf.mxu0 }
0x133f   :  { %v1336_v52 = vadd.f32 %v1334_v49, %v3214_v22  ;;  %v1037_v49 = vld [vmem:[#allocation2 + $0x11] ss:$0 sm:$0xff] }
0x1341   :  { %v1340_v53 = vsel %vm163_vm3, %v1336_v52, -inf }
0x1342   :  { %1341 = vmax.xlane.f32.xlu1 %v1340_v53 }
0x1353   :  { %1460 = vrot.lane.b32.xlu1 %v3396_v63, %s3126_s16 }
0x1357   :  { %1458 = vrot.lane.b32.xlu1 %v3396_v63, %s3127_s17 }
0x13c7   :  { %v1339_v0 = vpop.xlane.xlu0 %1338 }
0x13c8   :  { %v1343_v57 = vsub.f32 %v1335_v47, %v1339_v0 }
0x13ca   :  { %v1345_v17 = vmul.f32 1.442695, %v1343_v57 }
0x13cb   :  { %v1342_v58 = vpop.xlane.xlu1 %1341 }
0x13cc   :  { %3051 = vpow2.f32 %v1345_v17  ;;  %v1344_v59 = vsub.f32 %v1336_v52, %v1342_v58 }
0x13ce   :  { %v1347_v60 = vmul.f32 1.442695, %v1344_v59 }
0x13cf   :  { %v1461_v15 = vpop.permute.xlu1 %1460 }
0x13d0   :  { %3053 = vpow2.f32 %v1347_v60  ;;  %v1466_v18 = vsel %vm111_vm2, %v1461_v15, 0 }
0x13d3   :  { %v1459_v19 = vpop.permute.xlu1 %1458 }
0x13d9   :  { %v3052_v13 = vpop.eup %3051 }
0x13da   :  { %v1349_v22 = vsel %vm163_vm3, %v3052_v13, 0.0 }
0x13db   :  { %1350 = vadd.xlane.f32.xlu0 %v1349_v22 }
0x13dd   :  { %v3054_v61 = vpop.eup %3053 }
0x13de   :  { %v1352_v62 = vsel %vm163_vm3, %v3054_v61, 0.0 }
0x13df   :  { %1353 = vadd.xlane.f32.xlu0 %v1352_v62 }
0x13f5   :  { %1360 = vrot.lane.b32.xlu0 %v3396_v63, %s3125_s15 }
0x13f7   :  { %v3447_v1 = vpop.f32.mrf.mxu1 }
0x13f8   :  { %v1280_v50 = vadd.f32 %v3447_v1, %v1037_v49 }
0x13f9   :  { %v2837_v2 = vpop.f32.mrf.mxu1 }
0x13fb   :  { %v3449_v5 = vpop.f32.mrf.mxu1 }
0x13fc   :  { %v1281_v0 = vadd.f32 %v3449_v5, %v1037_v49 }
0x13fd   :  { %v2838_v6 = vpop.f32.mrf.mxu1 }
0x1464   :  { %v1351_v7 = vpop.xlane.xlu0 %1350 }
0x1465   :  { %3055 = vrcp.f32 %v1351_v7  ;;  %v2556_v7 = vld [vmem:[%s3668_s1 + $0x68] sm:$0xf] }
0x1468   :  { %v1354_v8 = vpop.xlane.xlu0 %1353 }
0x1469   :  { %3057 = vrcp.f32 %v1354_v8  ;;  %v1589_v8 = vsel %vm239_vm4, %v2556_v7, 0 }
0x146c   :  { %v1361_v9 = vpop.permute.xlu0 %1360 }
0x146d   :  { %2846 = vmatpush3.bf16.msra.mxu1 %v1361_v9 }
0x146e   :  { %2857 = vmatprep.subr.bf16.mxu1 %v3392_v56 }
0x1472   :  { %v3056_v10 = vpop.eup %3055 }
0x1473   :  { %v1357_v12 = vmul.f32 %v3056_v10, %v3052_v13 }
0x1476   :  { %v3058_v11 = vpop.eup %3057 }
0x1477   :  { %v1358_v14 = vmul.f32 %v3058_v11, %v3054_v61 }
0x1479   :  { %v1359_v16 = vpack.c.bf16 %v1358_v14, %v1357_v12 }
0x147b   :  { %2848 = vmatmul.mubr.msk.bf16.vlgmr.msra.gmra.mxu1 %vm163_vm3, %v1359_v16 }
0x147c   :  { %2858 = vmatpush3.bf16.xpose.msra.mxu1 %v1466_v18  ;;  %2859 = vmatprep.mubr.msk.bf16.mxu1 %vm3120_vm0, %v3392_v56 }
0x147d   :  { %2869 = vmatprep.subr.bf16.mxu1 %v3392_v56 }
0x1483   :  { %2860 = vmatmul.mubr.msk.bf16.vlgmr.msra.gmra.mxu1 %vm111_vm2, %v1459_v19 }
0x1484   :  { %2871 = vmatprep.mubr.msk.bf16.mxu1 %vm3120_vm0, %v3392_v56  ;;  %2870 = vmatpush3.bf16.msra.mxu1 %v1589_v8 }
0x1485   :  { %2881 = vmatprep.subr.bf16.mxu1 %v3392_v56 }
0x153b   :  { %v1400_v23 = vpop.f32.mrf.mxu1 }
0x153d   :  { %v2849_v24 = vpop.f32.mrf.mxu1 }
0x153f   :  { %v1403_v25 = vpop.f32.mrf.mxu1 }
0x1540   :  { %v1408_v26 = vpack.c.bf16 %v1403_v25, %v1400_v23 }
0x1541   :  { %v2850_v27 = vpop.f32.mrf.mxu1 }
0x1542   :  { %2854 = vmatmul.mubr.msk.bf16.vlgmr.msra.gmra.mxu0 %vm111_vm2, %v1408_v26 }
0x1543   :  { %v1502_v3 = vpop.f32.mrf.mxu1  ;;  %2865 = vmatprep.mubr.msk.bf16.mxu0 %vm3120_vm0, %v3392_v56 }
0x1544   :  { %v1509_v28 = vmul.f32 0.35355338, %v1502_v3 }
0x1545   :  { %v2861_v29 = vpop.f32.mrf.mxu1 }
0x1546   :  { %v1511_v30 = vadd.f32 %v3471_v4, %v1509_v28 }
0x1547   :  { %v1505_v31 = vpop.f32.mrf.mxu1 }
0x1548   :  { %v1510_v32 = vmul.f32 0.35355338, %v1505_v31  ;;  %v1513_v33 = vsel %vm163_vm3, %v1511_v30, -inf }
0x1549   :  { %1514 = vmax.xlane.f32.xlu0 %v1513_v33  ;;  %v2862_v34 = vpop.f32.mrf.mxu1 }
0x154a   :  { %v1512_v36 = vadd.f32 %v3478_v35, %v1510_v32 }
0x154c   :  { %v1516_v37 = vsel %vm163_vm3, %v1512_v36, -inf }
0x154d   :  { %1517 = vmax.xlane.f32.xlu1 %v1516_v37 }
0x155e   :  { %1536 = vrot.lane.b32.xlu1 %v3396_v63, %s3128_s20 }
0x1562   :  { %1634 = vrot.lane.b32.xlu1 %v3396_v63, %s3130_s22 }
0x15d2   :  { %v1515_v38 = vpop.xlane.xlu0 %1514 }
0x15d3   :  { %v1519_v39 = vsub.f32 %v1511_v30, %v1515_v38 }
0x15d5   :  { %v1521_v40 = vmul.f32 1.442695, %v1519_v39 }
0x15d6   :  { %v1518_v41 = vpop.xlane.xlu1 %1517 }
0x15d7   :  { %3059 = vpow2.f32 %v1521_v40  ;;  %v1520_v42 = vsub.f32 %v1512_v36, %v1518_v41 }
0x15d9   :  { %v1523_v43 = vmul.f32 1.442695, %v1520_v42 }
0x15da   :  { %v1537_v44 = vpop.permute.xlu1 %1536 }
0x15db   :  { %3061 = vpow2.f32 %v1523_v43  ;;  %2864 = vmatpush3.bf16.msra.mxu0 %v1537_v44 }
0x15dc   :  { %2875 = vmatprep.subr.bf16.mxu0 %v3392_v56 }
0x15de   :  { %v1635_v5 = vpop.permute.xlu1 %1634 }
0x15e4   :  { %v3060_v45 = vpop.eup %3059 }
0x15e5   :  { %v1525_v46 = vsel %vm163_vm3, %v3060_v45, 0.0 }
0x15e6   :  { %1526 = vadd.xlane.f32.xlu0 %v1525_v46 }
0x15e8   :  { %v3062_v47 = vpop.eup %3061 }
0x15e9   :  { %v1528_v48 = vsel %vm163_vm3, %v3062_v47, 0.0 }
0x15ea   :  { %1529 = vadd.xlane.f32.xlu0 %v1528_v48  ;;  %v2560_v48 = vld [vmem:[%s3668_s1 + $0x6c] sm:$0xf] }
0x15eb   :  { %v1765_v49 = vsel %vm239_vm4, %v2560_v48, 0 }
0x1600   :  { %1636 = vrot.lane.b32.xlu0 %v3396_v63, %s3129_s21 }
0x1602   :  { %v1449_v51 = vpop.f32.mrf.mxu0 }
0x1603   :  { %v3492_v52 = vadd.f32 %v1449_v51, %v1280_v50 }
0x1604   :  { %v2855_v53 = vpop.f32.mrf.mxu0 }
0x1606   :  { %v1452_v57 = vpop.f32.mrf.mxu0 }
0x1607   :  { %v1457_v17 = vadd.f32 %v1452_v57, %v1281_v0 }
0x1608   :  { %v2856_v58 = vpop.f32.mrf.mxu0 }
0x166f   :  { %v1527_v59 = vpop.xlane.xlu0 %1526 }
0x1670   :  { %3063 = vrcp.f32 %v1527_v59 }
0x1673   :  { %v1530_v60 = vpop.xlane.xlu0 %1529 }
0x1674   :  { %3065 = vrcp.f32 %v1530_v60 }
0x1677   :  { %v1637_v2 = vpop.permute.xlu0 %1636 }
0x1678   :  { %v1642_v1 = vsel %vm111_vm2, %v1637_v2, 0 }
0x167d   :  { %v3064_v13 = vpop.eup %3063 }
0x167e   :  { %v1533_v61 = vmul.f32 %v3064_v13, %v3060_v45 }
0x1681   :  { %v3066_v22 = vpop.eup %3065 }
0x1682   :  { %v1534_v62 = vmul.f32 %v3066_v22, %v3062_v47 }
0x1684   :  { %v1535_v6 = vpack.c.bf16 %v1534_v62, %v1533_v61 }
0x1686   :  { %2866 = vmatmul.mubr.msk.bf16.vlgmr.msra.gmra.mxu0 %vm163_vm3, %v1535_v6 }
0x1687   :  { %2876 = vmatpush3.bf16.xpose.msra.mxu0 %v1642_v1  ;;  %2877 = vmatprep.mubr.msk.bf16.mxu0 %vm3120_vm0, %v3392_v56 }
0x1688   :  { %2887 = vmatprep.subr.bf16.mxu0 %v3392_v56 }
0x168e   :  { %2878 = vmatmul.mubr.msk.bf16.vlgmr.msra.gmra.mxu0 %vm111_vm2, %v1635_v5 }
0x168f   :  { %2889 = vmatprep.mubr.msk.bf16.mxu0 %vm3120_vm0, %v3392_v56  ;;  %2888 = vmatpush3.bf16.msra.mxu0 %v1765_v49 }
0x1690   :  { %2901 = vmatprep.subr.bf16.mxu0 %v3392_v56 }
0x1746   :  { %v1576_v9 = vpop.f32.mrf.mxu0 }
0x1748   :  { %v2867_v10 = vpop.f32.mrf.mxu0 }
0x174a   :  { %v1579_v11 = vpop.f32.mrf.mxu0 }
0x174b   :  { %v1584_v12 = vpack.c.bf16 %v1579_v11, %v1576_v9 }
0x174c   :  { %v2868_v14 = vpop.f32.mrf.mxu0 }
0x174d   :  { %2872 = vmatmul.mubr.msk.bf16.vlgmr.msra.gmra.mxu1 %vm111_vm2, %v1584_v12  ;;  %v2967_v14 = vld [vmem:[%s3668_s1 + $0x70] sm:$0xff]  }
0x174e   :  { %v1678_v15 = vpop.f32.mrf.mxu0  ;;  %2883 = vmatprep.mubr.msk.bf16.mxu1 %vm3120_vm0, %v3392_v56 }
0x174f   :  { %v1685_v16 = vmul.f32 0.35355338, %v1678_v15 }
0x1750   :  { %v2879_v18 = vpop.f32.mrf.mxu0 }
0x1751   :  { %v1687_v19 = vadd.f32 %v3471_v4, %v1685_v16 }
0x1752   :  { %v1681_v20 = vpop.f32.mrf.mxu0 }
0x1753   :  { %v1686_v21 = vmul.f32 0.35355338, %v1681_v20  ;;  %v1689_v23 = vsel %vm163_vm3, %v1687_v19, -inf }
0x1754   :  { %1690 = vmax.xlane.f32.xlu1 %v1689_v23  ;;  %v2880_v24 = vpop.f32.mrf.mxu0 }
0x1755   :  { %v1688_v25 = vadd.f32 %v3478_v35, %v1686_v21 }
0x1757   :  { %v1692_v26 = vsel %vm163_vm3, %v1688_v25, -inf }
0x1758   :  { %1693 = vmax.xlane.f32.xlu0 %v1692_v26 }
0x17dd   :  { %v1691_v27 = vpop.xlane.xlu1 %1690 }
0x17de   :  { %v1695_v3 = vsub.f32 %v1687_v19, %v1691_v27 }
0x17e0   :  { %v1697_v28 = vmul.f32 1.442695, %v1695_v3 }
0x17e1   :  { %v1694_v29 = vpop.xlane.xlu0 %1693 }
0x17e2   :  { %3067 = vpow2.f32 %v1697_v28  ;;  %v1696_v30 = vsub.f32 %v1688_v25, %v1694_v29  ;;  %v1038_v25 = vld [vmem:[#allocation2 + $0x12] ss:$0 sm:$0xff]  ;;  %v1039_v28 = vld [vmem:[#allocation2 + $0x13] ss:$0 sm:$0xff] }
0x17e4   :  { %v1699_v31 = vmul.f32 1.442695, %v1696_v30 }
0x17e6   :  { %3069 = vpow2.f32 %v1699_v31 }
0x17ef   :  { %v3068_v4 = vpop.eup %3067 }
0x17f0   :  { %v1701_v32 = vsel %vm163_vm3, %v3068_v4, 0.0 }
0x17f1   :  { %1702 = vadd.xlane.f32.xlu0 %v1701_v32  ;;  %v2968_v32 = vld [vmem:[%s3668_s1 + $0x98] sm:$0xff]  }
0x17f3   :  { %v3070_v33 = vpop.eup %3069 }
0x17f4   :  { %v1704_v34 = vsel %vm163_vm3, %v3070_v33, 0.0 }
0x17f5   :  { %1705 = vadd.xlane.f32.xlu1 %v1704_v34  ;;  %v2970_v34 = vld [vmem:[%s3668_s1 + $0x88] sm:$0xff]  }
0x1807   :  { %1712 = vrot.lane.b32.xlu0 %v3396_v63, %s3131_s24 }
0x180d   :  { %v1625_v35 = vpop.f32.mrf.mxu1 }
0x180e   :  { %v1632_v36 = vadd.f32 %v1625_v35, %v3492_v52  ;;  %v2971_v35 = vld [vmem:[%s3668_s1 + $0x80] sm:$0xff]  }
0x180f   :  { %v2873_v37 = vpop.f32.mrf.mxu1 }
0x1811   :  { %v1628_v38 = vpop.f32.mrf.mxu1 }
0x1812   :  { %v1633_v39 = vadd.f32 %v1628_v38, %v1457_v17 }
0x1813   :  { %v2874_v40 = vpop.f32.mrf.mxu1 }
0x187a   :  { %v1703_v41 = vpop.xlane.xlu0 %1702 }
0x187b   :  { %3071 = vrcp.f32 %v1703_v41 }
0x187e   :  { %v1706_v42 = vpop.xlane.xlu1 %1705  ;;  %v1713_v43 = vpop.permute.xlu0 %1712 }
0x187f   :  { %3073 = vrcp.f32 %v1706_v42  ;;  %2882 = vmatpush3.bf16.msra.mxu1 %v1713_v43 }
0x1880   :  { %2893 = vmatprep.subr.bf16.mxu1 %v3392_v56 }
0x1888   :  { %v3072_v44 = vpop.eup %3071 }
0x1889   :  { %v1709_v46 = vmul.f32 %v3072_v44, %v3068_v4 }
0x188c   :  { %v3074_v45 = vpop.eup %3073 }
0x188d   :  { %v1710_v47 = vmul.f32 %v3074_v45, %v3070_v33  ;;  %v2969_v33 = vld [vmem:[%s3668_s1 + $0x90] sm:$0xff]  }
0x188f   :  { %v1711_v63 = vpack.c.bf16 %v1710_v47, %v1709_v46 }
0x1891   :  { %2884 = vmatmul.mubr.msk.bf16.vlgmr.msra.gmra.mxu1 %vm163_vm3, %v1711_v63 }
0x1892   :  { %2897 = vmatprep.mubr.msk.bf16.mxu1 %vm3120_vm0, %v3392_v56 }
0x1951   :  { %v1752_v50 = vpop.f32.mrf.mxu1 }
0x1953   :  { %v2885_v51 = vpop.f32.mrf.mxu1 }
0x1955   :  { %v1755_v52 = vpop.f32.mrf.mxu1 }
0x1956   :  { %v1760_v53 = vpack.c.bf16 %v1755_v52, %v1752_v50 }
0x1957   :  { %v2886_v0 = vpop.f32.mrf.mxu1 }
0x1958   :  { %2890 = vmatmul.mubr.msk.bf16.vlgmr.msra.gmra.mxu0 %vm111_vm2, %v1760_v53 }
0x1959   :  { %2909 = vmatprep.mubr.msk.bf16.mxu0 %vm3120_vm0, %v3392_v56  ;;  %2902 = vmatpush3.bf16.msra.mxu0 %v2968_v32 }
0x195a   :  { %2903 = vmatprep.subr.bf16.mxu0 %v3392_v56 }
0x195d   :  { %2904 = vmatpush3.bf16.msra.mxu0 %v2969_v33 }
0x195e   :  { %2905 = vmatprep.subr.bf16.mxu0 %v3392_v56 }
0x1961   :  { %2906 = vmatpush3.bf16.msra.mxu0 %v2970_v34 }
0x1962   :  { %2907 = vmatprep.subr.bf16.mxu0 %v3392_v56 }
0x1965   :  { %2908 = vmatpush3.bf16.msra.mxu0 %v2971_v35  ;;  %v2974_v35 = vld [vmem:[%s3670_s3 + $0x14] ss:$8 sps:$4 sm:$0xff]  }
0x1a18   :  { %v1801_v57 = vpop.f32.mrf.mxu0 }
0x1a19   :  { %v1808_v17 = vadd.f32 %v1801_v57, %v1632_v36  ;;  %v1040_v36 = vld [vmem:[#allocation2 + $0x14] ss:$0 sm:$0xff] }
0x1a1a   :  { %v2891_v58 = vpop.f32.mrf.mxu0 }
0x1a1b   :  { %v1810_v59 = vadd.f32 %v1808_v17, %v3382_v54 }
0x1a1c   :  { %v1804_v60 = vpop.f32.mrf.mxu0 }
0x1a1d   :  { %v1809_v13 = vadd.f32 %v1804_v60, %v1633_v39  ;;  %v1812_v22 = vsel %vm62_vm1, %v1810_v59, 0.0 }
0x1a1e   :  { %1813 = vadd.xlane.f32.xlu1 %v1812_v22  ;;  %v2892_v61 = vpop.f32.mrf.mxu0 }
0x1a1f   :  { %v1811_v62 = vadd.f32 %v1809_v13, %v3384_v55  ;;  %v2966_v55 = vld [vmem:[%s3668_s1 + $0x78] sm:$0xff]   ;;  %v1041_v61 = vld [vmem:[#allocation2 + $0x15] ss:$0 sm:$0xff] }
0x1a20   :  { %2894 = vmatpush3.bf16.msra.mxu1 %v2966_v55 }
0x1a21   :  { %v1815_v2 = vsel %vm62_vm1, %v1811_v62, 0.0  ;;  %2895 = vmatprep.subr.bf16.mxu1 %v3392_v56 }
0x1a22   :  { %1816 = vadd.xlane.f32.xlu1 %v1815_v2 }
0x1a24   :  { %2896 = vmatpush3.bf16.msra.mxu1 %v2967_v14 }
0x1a25   :  { %2913 = vmatprep.subr.mxu1 %v3392_v56 }
0x1aa7   :  { %v1814_v6 = vpop.xlane.xlu1 %1813 }
0x1aa8   :  { %v1818_v1 = vmul.f32 0.03125, %v1814_v6 }
0x1aaa   :  { %v1820_v5 = vsub.f32 %v1810_v59, %v1818_v1 }
0x1aab   :  { %v1817_v7 = vpop.xlane.xlu1 %1816 }
0x1aac   :  { %v1819_v8 = vmul.f32 0.03125, %v1817_v7  ;;  %v1822_v9 = vmul.f32 %v1820_v5, %v1820_v5 }
0x1aae   :  { %v1821_v10 = vsub.f32 %v1811_v62, %v1819_v8  ;;  %v1824_v54 = vsel %vm62_vm1, %v1822_v9, 0.0 }
0x1aaf   :  { %1825 = vadd.xlane.f32.xlu1 %v1824_v54 }
0x1ab0   :  { %v1823_v11 = vmul.f32 %v1821_v10, %v1821_v10 }
0x1ab2   :  { %v1827_v12 = vsel %vm62_vm1, %v1823_v11, 0.0 }
0x1ab3   :  { %1828 = vadd.xlane.f32.xlu1 %v1827_v12 }
0x1b38   :  { %v1826_v15 = vpop.xlane.xlu1 %1825 }
0x1b39   :  { %v1830_v16 = vmul.f32 0.03125, %v1826_v15 }
0x1b3b   :  { %v1832_v18 = vadd.f32 1e-12, %v1830_v16 }
0x1b3c   :  { %v1829_v19 = vpop.xlane.xlu1 %1828 }
0x1b3d   :  { %3075 = vrsqrt.f32 %v1832_v18  ;;  %v1831_v20 = vmul.f32 0.03125, %v1829_v19 }
0x1b3f   :  { %v1833_v21 = vadd.f32 1e-12, %v1831_v20 }
0x1b41   :  { %3077 = vrsqrt.f32 %v1833_v21 }
0x1b4a   :  { %v3076_v23 = vpop.eup %3075 }
0x1b4b   :  { %v1836_v24 = vmul.f32 %v3076_v23, %v1820_v5 }
0x1b4d   :  { %v1838_v3 = vmul.f32 %v1836_v24, %v1038_v25 }
0x1b4e   :  { %v3078_v26 = vpop.eup %3077 }
0x1b4f   :  { %v1837_v27 = vmul.f32 %v3078_v26, %v1821_v10  ;;  %v1840_v30 = vadd.f32 %v1838_v3, %v1039_v28 }
0x1b51   :  { %v1839_v29 = vmul.f32 %v1837_v27, %v1038_v25 }
0x1b53   :  { %v1841_v31 = vadd.f32 %v1839_v29, %v1039_v28  ;;  %v1042_v28 = vld [vmem:[#allocation2 + $0x16] ss:$0 sm:$0xff] }
0x1b55   :  { %v1854_v4 = vpack.c.bf16 %v1841_v31, %v1840_v30 }
0x1b57   :  { %2898 = vmatmul.mubr.msk.bf16.vlgmr.msra.gmra.mxu1 %vm62_vm1, %v1854_v4 }
0x1b58   :  { %2917 = vmatprep.mubr.msk.f32.mxu1 %vm3120_vm0, %v3392_v56 }
0x1c17   :  { %v1904_v37 = vpop.f32.mrf.mxu1 }
0x1c18   :  { %v1905_v38 = vadd.f32 %v1904_v37, %v1040_v36  ;;  %v36_v37 = vld [vmem:[%s3667_s0 + $0x20] sm:$0x3] }
0x1c19   :  { %v2899_v39 = vpop.f32.mrf.mxu1 }
0x1c1a   :  { %v1913_v40 = vmul.f32 0.044715, %v1905_v38  ;;  %v1911_v57 = vmul.f32 0.5, %v1905_v38  ;;  %v2977_v39 = vld [vmem:[%s3670_s3 + $0x4] ss:$8 sps:$4 sm:$0xff]  }
0x1c1b   :  { %v1907_v41 = vpop.f32.mrf.mxu1 }
0x1c1c   :  { %v1915_v42 = vmul.f32 %v1913_v40, %v1905_v38  ;;  %v1908_v43 = vadd.f32 %v1907_v41, %v1040_v36  ;;  %v2975_v40 = vld [vmem:[%s3670_s3] ss:$8 sps:$4 sm:$0xff]   ;;  %v3132_v41 = vmov 0  }
0x1c1d   :  { %v2900_v44 = vpop.f32.mrf.mxu1 }
0x1c1e   :  { %v1917_v45 = vmul.f32 %v1915_v42, %v1905_v38  ;;  %v1914_v46 = vmul.f32 0.044715, %v1908_v43  ;;  %v1912_v17 = vmul.f32 0.5, %v1908_v43  ;;  %v2978_v42 = vld [vmem:[%s3670_s3 + $0x110] ss:$8 sps:$4 sm:$0xff]  }
0x1c1f   :  { %v2980_v44 = vld [vmem:[%s3670_s3 + $0x100] ss:$8 sps:$4 sm:$0xff]   ;;  %2684 = vmatprep.subr.bf16.mxu0 %v2978_v42 }
0x1c20   :  { %v1919_v47 = vadd.f32 %v1917_v45, %v1905_v38  ;;  %v1916_v63 = vmul.f32 %v1914_v46, %v1908_v43  ;;  %v2972_v38 = vld [vmem:[%s3670_s3 + $0x10] ss:$8 sps:$4 sm:$0xff]   ;;  %v2981_v45 = vld [vmem:[%s3670_s3 + $0x80] ss:$8 sps:$4 sm:$0xff]  }
0x1c21   :  { %v2982_v46 = vld [vmem:[%s3670_s3 + $0xf0] ss:$8 sps:$4 sm:$0xff]  }
0x1c22   :  { %v1921_v48 = vmul.f32 0.7978846, %v1919_v47  ;;  %v1918_v49 = vmul.f32 %v1916_v63, %v1908_v43  ;;  %v2983_v47 = vld [vmem:[%s3670_s3 + $0x70] ss:$8 sps:$4 sm:$0xff]   ;;  %v2984_v63 = vld [vmem:[%s3670_s3 + $0xe0] ss:$8 sps:$4 sm:$0xff]  }
0x1c24   :  { %3079 = vtanh.f32 %v1921_v48  ;;  %v1920_v50 = vadd.f32 %v1918_v49, %v1908_v43  ;;  %v2979_v43 = vld [vmem:[%s3670_s3 + $0x90] ss:$8 sps:$4 sm:$0xff]   ;;  %v2985_v48 = vld [vmem:[%s3670_s3 + $0x60] ss:$8 sps:$4 sm:$0xff]  }
0x1c25   :  { %v2986_v49 = vld [vmem:[%s3670_s3 + $0xd0] ss:$8 sps:$4 sm:$0xff]  }
0x1c26   :  { %v1922_v51 = vmul.f32 0.7978846, %v1920_v50  ;;  %v2987_v50 = vld [vmem:[%s3670_s3 + $0x50] ss:$8 sps:$4 sm:$0xff]  }
0x1c28   :  { %3081 = vtanh.f32 %v1922_v51  ;;  %v2988_v51 = vld [vmem:[%s3670_s3 + $0xc0] ss:$8 sps:$4 sm:$0xff]  }
0x1c31   :  { %v3080_v52 = vpop.eup %3079 }
0x1c32   :  { %v1925_v53 = vadd.f32 1.0, %v3080_v52  ;;  %v2989_v52 = vld [vmem:[%s3670_s3 + $0x40] ss:$8 sps:$4 sm:$0xff]  }
0x1c34   :  { %v1927_v59 = vmul.f32 %v1925_v53, %v1911_v57 }
0x1c35   :  { %v3082_v0 = vpop.eup %3081 }
0x1c36   :  { %v1926_v58 = vadd.f32 1.0, %v3082_v0 }
0x1c38   :  { %v1928_v60 = vmul.f32 %v1926_v58, %v1912_v17  ;;  %v2990_v17 = vld [vmem:[%s3670_s3 + $0xb0] ss:$8 sps:$4 sm:$0xff]  }
0x1c39   :  { %v2991_v58 = vld [vmem:[%s3670_s3 + $0x30] ss:$8 sps:$4 sm:$0xff]  }
0x1c3a   :  { %v1929_v13 = vpack.c.bf16 %v1928_v60, %v1927_v59  ;;  %v2992_v59 = vld [vmem:[%s3670_s3 + $0xa0] ss:$8 sps:$4 sm:$0xff]  }
0x1c3b   :  { %v2993_v60 = vld [vmem:[%s3670_s3 + $0x20] ss:$8 sps:$4 sm:$0xff]  }
0x1c3c   :  { %2910 = vmatmul.mubr.msk.bf16.vlgmr.msra.gmra.mxu0 %vm959_vm5, %v1929_v13  ;;  %v2994_v13 = vld [vmem:[%s3670_s3 + $0x150] ss:$8 sps:$4 sm:$0xff]  }
0x1c3d   :  { %2685 = vmatpush3.bf16.msra.mxu0 %v2979_v43 }
0x1c3e   :  { %2686 = vmatprep.subr.bf16.mxu0 %v2980_v44 }
0x1c41   :  { %2687 = vmatpush3.bf16.msra.mxu0 %v2981_v45 }
0x1c42   :  { %2688 = vmatprep.subr.bf16.mxu0 %v2982_v46 }
0x1c45   :  { %2689 = vmatpush3.bf16.msra.mxu0 %v2983_v47 }
0x1c46   :  { %2690 = vmatprep.subr.bf16.mxu0 %v2984_v63 }
0x1c49   :  { %2691 = vmatpush3.bf16.msra.mxu0 %v2985_v48 }
0x1c4a   :  { %2692 = vmatprep.subr.bf16.mxu0 %v2986_v49 }
0x1c4d   :  { %2693 = vmatpush3.bf16.msra.mxu0 %v2987_v50 }
0x1c4e   :  { %2694 = vmatprep.subr.bf16.mxu0 %v2988_v51 }
0x1c51   :  { %2695 = vmatpush3.bf16.msra.mxu0 %v2989_v52 }
0x1c52   :  { %2696 = vmatprep.subr.bf16.mxu0 %v2990_v17 }
0x1c55   :  { %2697 = vmatpush3.bf16.msra.mxu0 %v2991_v58 }
0x1c56   :  { %2698 = vmatprep.subr.bf16.mxu0 %v2992_v59 }
0x1c59   :  { %2699 = vmatpush3.bf16.msra.mxu0 %v2993_v60 }
0x1cfc   :  { %v1991_v22 = vpop.f32.mrf.mxu0 }
0x1cfd   :  { %v1992_v6 = vadd.f32 %v1991_v22, %v1041_v61  ;;  %v2156_v22 = vlaneseq }
0x1cfe   :  { %v2911_v62 = vpop.f32.mrf.mxu0 }
0x1cff   :  { %v1998_v9 = vadd.f32 %v1992_v6, %v1840_v30  ;;  %v1043_v30 = vld [vmem:[#allocation2 + $0x17] ss:$0 sm:$0xff] }
0x1d00   :  { %v1994_v2 = vpop.f32.mrf.mxu0 }
0x1d01   :  { %v1995_v1 = vadd.f32 %v1994_v2, %v1041_v61  ;;  %v2000_v10 = vsel %vm62_vm1, %v1998_v9, 0.0  ;;  %v2157_v61 = vshrl.u32 %v2156_v22, 7  ;;  %v2104_v2 = vld [vmem:[#allocation2 + $0x20] ss:$8 sm:$0x3] }
0x1d02   :  { %v2912_v5 = vpop.f32.mrf.mxu0 }
0x1d03   :  { %v1999_v7 = vadd.f32 %v1995_v1, %v1841_v31  ;;  %v2158_v62 = vsub.s32 0, %v2157_v61  ;;  %v2162_v6 = vsub.s32 1, %v2157_v61 }
0x1d05   :  { %v2003_v8 = vsel %vm62_vm1, %v1999_v7, 0.0  ;;  %v2159_v1 = vrot.slane %v2104_v2, %v2158_v62  ;;  %v2163_v5 = vrot.slane %v2104_v2, %v2162_v6 }
0x1d06   :  { %2004 = vadd.xlane.f32.xlu1 %v2003_v8 }
0x1d0a   :  { %2001 = vadd.xlane.f32.xlu1 %v2000_v10 }
0x1d8f   :  { %v2005_v54 = vpop.xlane.xlu1 %2004 }
0x1d90   :  { %v2007_v11 = vmul.f32 0.03125, %v2005_v54 }
0x1d92   :  { %v2009_v12 = vsub.f32 %v1999_v7, %v2007_v11 }
0x1d93   :  { %v2002_v55 = vpop.xlane.xlu1 %2001 }
0x1d94   :  { %v2006_v14 = vmul.f32 0.03125, %v2002_v55  ;;  %v2011_v15 = vmul.f32 %v2009_v12, %v2009_v12 }
0x1d96   :  { %v2008_v16 = vsub.f32 %v1998_v9, %v2006_v14  ;;  %v2015_v18 = vsel %vm62_vm1, %v2011_v15, 0.0 }
0x1d97   :  { %2016 = vadd.xlane.f32.xlu0 %v2015_v18  ;;  %v2996_v18 = vld [vmem:[%s3670_s3 + $0x130] ss:$8 sps:$4 sm:$0xff]  }
0x1d98   :  { %v2010_v19 = vmul.f32 %v2008_v16, %v2008_v16 }
0x1d9a   :  { %v2012_v20 = vsel %vm62_vm1, %v2010_v19, 0.0  ;;  %v2997_v19 = vld [vmem:[%s3670_s3 + $0x120] ss:$8 sps:$4 sm:$0xff]  }
0x1d9b   :  { %2013 = vadd.xlane.f32.xlu1 %v2012_v20 }
0x1e20   :  { %v2017_v21 = vpop.xlane.xlu0 %2016 }
0x1e21   :  { %v2019_v23 = vmul.f32 0.03125, %v2017_v21  ;;  %v2105_v21 = vld [vmem:[#allocation2 + $0x21] ss:$0 sm:$0xff] }
0x1e23   :  { %v2021_v24 = vadd.f32 1e-12, %v2019_v23 }
0x1e24   :  { %v2014_v25 = vpop.xlane.xlu1 %2013 }
0x1e25   :  { %3083 = vrsqrt.f32 %v2021_v24  ;;  %v2018_v26 = vmul.f32 0.03125, %v2014_v25 }
0x1e27   :  { %v2020_v27 = vadd.f32 1e-12, %v2018_v26 }
0x1e29   :  { %3085 = vrsqrt.f32 %v2020_v27 }
0x1e32   :  { %v3084_v3 = vpop.eup %3083 }
0x1e33   :  { %v2025_v29 = vmul.f32 %v3084_v3, %v2009_v12 }
0x1e35   :  { %v2027_v31 = vmul.f32 %v2025_v29, %v1042_v28  ;;  %v2998_v29 = vld [vmem:[%s3670_s3 + $0x160] ss:$8 sps:$4 sm:$0xff]  }
0x1e36   :  { %v3086_v4 = vpop.eup %3085 }
0x1e37   :  { %v2029_v32 = vadd.f32 %v2027_v31, %v1043_v30  ;;  %v2024_v33 = vmul.f32 %v3086_v4, %v2008_v16  ;;  %v2995_v16 = vld [vmem:[%s3670_s3 + $0x140] ss:$8 sps:$4 sm:$0xff]   ;;  %s3133_s3 = smov 32  }
0x1e39   :  { %2914 = vmatpush3.msra.mxu1 %v2029_v32  ;;  %v2026_v34 = vmul.f32 %v2024_v33, %v1042_v28 }
0x1e3a   :  { %2915 = vmatprep.subr.mxu1 %v3392_v56 }
0x1e3b   :  { %v2028_v36 = vadd.f32 %v2026_v34, %v1043_v30  ;;  %v2106_v30 = vld [vmem:[#allocation2 + $0x22] ss:$0 sm:$0xff] }
0x1e3d   :  { %2916 = vmatpush3.msra.mxu1 %v2028_v36 }
0x1e3e   :  { %2918 = vmatmul.mubr.msk.f32.vlgmr.msra.gmra.mxu1 %vm163_vm3, %v36_v37  ;;  %2201 = vmatprep.subr.bf16.mxu1 %v2974_v35  ;;  %v2107_v37 = vld [vmem:[#allocation2 + $0x23] ss:$0 sm:$0xff] }
0x1e3f   :  { %2202 = vmatpush1.bf16.msra.mxu1 %v2972_v38  ;;  %2221 = vmatprep.mubr.bf16.mxu1 %v3132_v41 }
0x1e40   :  { %2203 = vmatprep.subr.bf16.mxu1 %v2977_v39 }
0x1e43   :  { %2204 = vmatpush1.bf16.msra.mxu1 %v2975_v40 }
0x1e44   :  { %2920 = vmatprep.subr.bf16.mxu1 %v3392_v56 }
0x1efe   :  { %v2099_v53 = vpop.f32.mrf.mxu1 }
0x1eff   :  { %v2154_v0 = vpack.c.bf16 %v2099_v53, %v2099_v53  ;;  %2504 = vst.msk [vmem:[%s3671_s4] sm:$0x3] %vm2503_vm6, %v2099_v53 }
0x1f00   :  { %v2919_v57 = vpop.f32.mrf.mxu1 }
0x1f01   :  { %2587 = vmatmul.mubr.msk.bf16.vlgmr.msra.gmra.mxu1 %vm62_vm1, %v2154_v0 }
0x1f02   :  { %2928 = vmatprep.mubr.msk.bf16.mxu1 %vm3120_vm0, %v3392_v56  ;;  %2921 = vmatpush3.bf16.msra.mxu1 %v2994_v13 }
0x1f03   :  { %2922 = vmatprep.subr.bf16.mxu1 %v3392_v56 }
0x1f06   :  { %2923 = vmatpush3.bf16.msra.mxu1 %v2995_v16 }
0x1f07   :  { %2924 = vmatprep.subr.bf16.mxu1 %v3392_v56 }
0x1f0a   :  { %2925 = vmatpush3.bf16.msra.mxu1 %v2996_v18 }
0x1f0b   :  { %2926 = vmatprep.subr.bf16.mxu1 %v3392_v56 }
0x1f0e   :  { %2927 = vmatpush3.bf16.msra.mxu1 %v2997_v19 }
0x1f0f   :  { %2932 = vmatprep.subr.bf16.mxu1 %v3392_v56 }
0x1fc1   :  { %v2223_v7 = vpop.f32.mrf.mxu1 }
0x1fc2   :  { %v2224_v8 = vadd.f32 %v2223_v7, %v2159_v1 }
0x1fc3   :  { %v2225_v9 = vpop.f32.mrf.mxu1 }
0x1fc4   :  { %v2226_v10 = vadd.f32 %v2225_v9, %v2163_v5  ;;  %v2230_v54 = vmax.f32 %v2224_v8, 0.0 }
0x1fc5   :  { %v2227_v11 = vpop.f32.mrf.mxu1 }
0x1fc6   :  { %v2231_v12 = vmax.f32 %v2226_v10, 0.0  ;;  %v2232_v15 = vpack.c.bf16 %v2230_v54, %v2230_v54 }
0x1fc7   :  { %v2228_v55 = vpop.f32.mrf.mxu1 }
0x1fc8   :  { %v2233_v14 = vpack.c.bf16 %v2231_v12, %v2231_v12 }
0x1fca   :  { %2362 = vmatprep.mubr.bf16.mxu0 %v2233_v14 }
0x1fcb   :  { %2363 = vmatmul.mubr.bf16.vlgmr.msra.gmra.mxu0 %v2232_v15 }
0x208b   :  { %v2700_v20 = vpop.f32.mrf.mxu0 }
0x208d   :  { %v2701_v23 = vpop.f32.mrf.mxu0 }
0x208e   :  { %v2702_v24 = vadd.f32 %v2701_v23, %v2700_v20 }
0x208f   :  { %v2703_v25 = vpop.f32.mrf.mxu0 }
0x2090   :  { %v2365_v26 = vadd.f32 %v2702_v24, %v2105_v21 }
0x2091   :  { %v2704_v27 = vpop.f32.mrf.mxu0 }
0x2092   :  { %v2370_v3 = vmax.f32 %v2365_v26, 0.0 }
0x2094   :  { %v2371_v28 = vpack.c.bf16 %v2370_v3, %v2370_v3 }
0x2096   :  { %2929 = vmatmul.mubr.msk.bf16.vlgmr.msra.gmra.mxu1 %vm959_vm5, %v2371_v28 }
0x2097   :  { %2934 = vmatprep.mubr.msk.bf16.mxu1 %vm3120_vm0, %v3392_v56  ;;  %2933 = vmatpush3.bf16.msra.mxu1 %v2998_v29 }
0x2156   :  { %v2433_v31 = vpop.f32.mrf.mxu1 }
0x2157   :  { %v2434_v4 = vadd.f32 %v2433_v31, %v2106_v30 }
0x2158   :  { %v2930_v32 = vpop.f32.mrf.mxu1 }
0x2159   :  { %v2439_v33 = vmax.f32 %v2434_v4, 0.0 }
0x215a   :  { %v2436_v34 = vpop.f32.mrf.mxu1 }
0x215b   :  { %v2440_v35 = vpack.c.bf16 %v2439_v33, %v2439_v33 }
0x215c   :  { %v2931_v36 = vpop.f32.mrf.mxu1 }
0x215d   :  { %2935 = vmatmul.mubr.msk.bf16.vlgmr.msra.gmra.mxu1 %vm163_vm3, %v2440_v35 }
0x221d   :  { %v2484_v38 = vpop.f32.mrf.mxu1 }
0x221e   :  { %v2485_v39 = vadd.f32 %v2484_v38, %v2107_v37 }
0x221f   :  { %v2936_v56 = vpop.f32.mrf.mxu1 }
0x2220   :  { %v2491_v40 = vsel %vm2490_vm7, %v2485_v39, -inf }
0x2221   :  { %2492 = vmax.xlane.f32.xlu1 %v2491_v40  ;;  %v2487_v41 = vpop.f32.mrf.mxu1 }
0x2223   :  { %v2937_v42 = vpop.f32.mrf.mxu1 }
0x22aa   :  { %v2493_v43 = vpop.xlane.xlu1 %2492 }
0x22ab   :  { %v2494_v44 = vsub.f32 %v2485_v39, %v2493_v43 }
0x22ad   :  { %v2495_v45 = vmul.f32 1.442695, %v2494_v44 }
0x22af   :  { %3087 = vpow2.f32 %v2495_v45 }
0x22bc   :  { %v3088_v46 = vpop.eup %3087 }
0x22bd   :  { %v2497_v47 = vsel %vm2490_vm7, %v3088_v46, 0.0 }
0x22be   :  { %2498 = vadd.xlane.f32.xlu1 %v2497_v47 }
0x2347   :  { %v2499_v63 = vpop.xlane.xlu1 %2498 }
0x2348   :  { %3089 = vrcp.f32 %v2499_v63 }
0x2355   :  { %v3090_v48 = vpop.eup %3089 }
0x2356   :  { %v2501_v49 = vmul.f32 %v3090_v48, %v3088_v46 }
0x2358   :  { %2506 = vrot.lane.b32.xlu1 %v2501_v49, %s3133_s3 }
0x23ca   :  { %v2507_v50 = vpop.permute.xlu1 %2506 }
0x23cb   :  { %2510 = vst.msk [vmem:[%s3671_s4] sm:$0x3] %vm2509_vm8, %v2507_v50 }
0x23cc   :  { %2515 = vsyncpa [#allocation3], 1 }

</bundles_post_ra>
